<compile_context>
chip_gen: v7x
topology: tpu7x:2x2x1
jax: 0.10.0
libtpu: 0.0.40
codegen_flags: <defaults>
</compile_context>

<pallas_src>
import math
import functools

import jax
import jax.numpy as jnp
from jax.experimental import pallas as pl
from jax.experimental.pallas import tpu as pltpu


# ------------------------------------------------------------------ helpers --
def _ln(x, w, b, eps=1e-5):
    # single-pass variance: E[x^2] - mean^2 (halves XLU reductions per LN)
    mu = jnp.mean(x, axis=-1, keepdims=True)
    var = jnp.mean(x * x, axis=-1, keepdims=True) - mu * mu
    return (x - mu) * jax.lax.rsqrt(var + eps) * w + b


def _gelu_exact(x):
    # PyTorch activation='gelu' in TransformerEncoderLayer == exact (erf) GELU.
    # TODO(synk): swap to tanh-approx GELU (EUP path) if bit-parity not needed.
    return 0.5 * x * (1.0 + jax.lax.erf(x * (1.0 / math.sqrt(2.0))))


# ----------------------------------------------------------- fused kernel ---
def ast_kernel(patches_ref, pos_ref, pw_ref, pb_ref,
               ln1w_ref, ln1b_ref, wqkv_ref, bqkv_ref, wo_ref, bo_ref,
               ln2w_ref, ln2b_ref, w1_ref, b1_ref, w2_ref, b2_ref,
               lnfw_ref, lnfb_ref, out_ref, x_res,
               *, S, E, num_heads):
    H = num_heads
    hd = E // H
    scale = 1.0 / math.sqrt(hd)
    d = pl.program_id(1)                       # depth (inner, "arbitrary") axis

    # --- d == 0 prologue: patch projection + bias + pos_embed ----------------
    @pl.when(d == 0)
    def _():
        p = patches_ref[0].astype(jnp.bfloat16)                       # (S, P)
        x0 = jnp.dot(p, pw_ref[...], preferred_element_type=jnp.float32)
        x_res[...] = x0 + pb_ref[...] + pos_ref[...]                  # (S, E)
        # pos_drop: identity (inference)

    x = x_res[...]                                                    # (S, E) f32

    # --- self-attention block (norm_first=True) ------------------------------
    h = _ln(x, ln1w_ref[0], ln1b_ref[0])
    qkv = (jnp.dot(h.astype(jnp.bfloat16), wqkv_ref[0],
                   preferred_element_type=jnp.float32)
           + bqkv_ref[0])                                             # (S, 3E)
    q = qkv[:, 0 * E:1 * E].reshape(S, H, hd).astype(jnp.bfloat16)
    k = qkv[:, 1 * E:2 * E].reshape(S, H, hd).astype(jnp.bfloat16)
    v = qkv[:, 2 * E:3 * E].reshape(S, H, hd).astype(jnp.bfloat16)

    # heads batched in one contraction (no per-head loop / lane concatenate)
    s = jnp.einsum('qhd,khd->hqk', q, k,
                   preferred_element_type=jnp.float32) * scale        # (H, S, S)
    s = s - jnp.max(s, axis=-1, keepdims=True)
    p = jnp.exp(s)
    p = p * pl.reciprocal(jnp.sum(p, axis=-1, keepdims=True), approx=True)
    ctx = jnp.einsum('hqk,khd->qhd', p.astype(jnp.bfloat16), v,
                     preferred_element_type=jnp.float32).reshape(S, E)
    attn = (jnp.dot(ctx.astype(jnp.bfloat16), wo_ref[0],
                    preferred_element_type=jnp.float32) + bo_ref[0])
    x = x + attn                                       # attn dropout: identity

    # --- feed-forward block ---------------------------------------------------
    h2 = _ln(x, ln2w_ref[0], ln2b_ref[0])
    f = (jnp.dot(h2.astype(jnp.bfloat16), w1_ref[0],
                 preferred_element_type=jnp.float32) + b1_ref[0])
    f = _gelu_exact(f)
    f = (jnp.dot(f.astype(jnp.bfloat16), w2_ref[0],
                 preferred_element_type=jnp.float32) + b2_ref[0])
    x_res[...] = x + f                                 # FFN dropout: identity

    # --- d == last epilogue: final LayerNorm + single lane-packed store ------
    @pl.when(d == pl.num_programs(1) - 1)
    def _():
        out_ref[0] = _ln(x_res[...], lnfw_ref[...], lnfb_ref[...])


# ----------------------------------------------------------------- wrapper --
def fused_forward(patches, pos, params, *, B, S, P, E, FF, depth, num_heads):
    kernel = functools.partial(ast_kernel, S=S, E=E, num_heads=num_heads)

    args = (patches, pos, params["patch_w"], params["patch_b"],
            params["ln1_w"], params["ln1_b"], params["wqkv"], params["bqkv"],
            params["wo"], params["bo"], params["ln2_w"], params["ln2_b"],
            params["w1"], params["b1"], params["w2"], params["b2"],
            params["lnf_w"], params["lnf_b"])

    in_specs = [
        pl.BlockSpec((1, S, P), lambda b, d: (b, 0, 0)),        # patches (per-batch)
        pl.BlockSpec((S, E), lambda b, d: (0, 0)),              # pos_embed (shared)
        pl.BlockSpec((P, E), lambda b, d: (0, 0)),              # patch_w (bf16)
        pl.BlockSpec((1, E), lambda b, d: (0, 0)),              # patch_b
        pl.BlockSpec((1, 1, E), lambda b, d: (d, 0, 0)),        # ln1_w
        pl.BlockSpec((1, 1, E), lambda b, d: (d, 0, 0)),        # ln1_b
        pl.BlockSpec((1, E, 3 * E), lambda b, d: (d, 0, 0)),    # wqkv (bf16)
        pl.BlockSpec((1, 1, 3 * E), lambda b, d: (d, 0, 0)),    # bqkv
        pl.BlockSpec((1, E, E), lambda b, d: (d, 0, 0)),        # wo (bf16)
        pl.BlockSpec((1, 1, E), lambda b, d: (d, 0, 0)),        # bo
        pl.BlockSpec((1, 1, E), lambda b, d: (d, 0, 0)),        # ln2_w
        pl.BlockSpec((1, 1, E), lambda b, d: (d, 0, 0)),        # ln2_b
        pl.BlockSpec((1, E, FF), lambda b, d: (d, 0, 0)),       # w1 (bf16)
        pl.BlockSpec((1, 1, FF), lambda b, d: (d, 0, 0)),       # b1
        pl.BlockSpec((1, FF, E), lambda b, d: (d, 0, 0)),       # w2 (bf16)
        pl.BlockSpec((1, 1, E), lambda b, d: (d, 0, 0)),        # b2
        pl.BlockSpec((1, E), lambda b, d: (0, 0)),              # lnf_w
        pl.BlockSpec((1, E), lambda b, d: (0, 0)),              # lnf_b
    ]
    out_spec = pl.BlockSpec((1, S, E), lambda b, d: (b, 0, 0))  # accumulator tile

    # advisory cost estimate for XLA scheduling
    flops = 2 * B * S * P * E
    per_layer = (2 * B * S * E * 3 * E            # qkv projection
                 + 2 * 2 * B * S * S * E          # scores + context
                 + 2 * B * S * E * E              # output projection
                 + 2 * 2 * B * S * E * FF)        # FFN
    flops += depth * per_layer
    transcendentals = depth * (B * num_heads * S * S + B * S * FF) + 3 * B * S
    bytes_accessed = int(sum(a.size * a.dtype.itemsize for a in args)
                         + B * S * E * 4)

    # per-step VMEM working set: 2x double-buffered per-layer weights + acts
    per_layer_w_bytes = sum(
        params[k].size * params[k].dtype.itemsize // depth
        for k in ("ln1_w", "ln1_b", "wqkv", "bqkv", "wo", "bo",
                  "ln2_w", "ln2_b", "w1", "b1", "w2", "b2"))
    act_bytes = 4 * S * (P + 4 * E + FF + max(num_heads * S, E)) * 4
    vmem_needed = 2 * per_layer_w_bytes + act_bytes + (P * E + S * (P + E)) * 4
    vmem_limit = None
    if vmem_needed > (30 << 20):
        # TODO(synk): re-derive for v7x (64 MiB physical); add FF-tiling there.
        vmem_limit = int(min(vmem_needed * 2, 60 << 20))

    return pl.pallas_call(
        kernel,
        out_shape=jax.ShapeDtypeStruct((B, S, E), jnp.float32),
        grid_spec=pltpu.PrefetchScalarGridSpec(
            num_scalar_prefetch=0,
            grid=(B, depth),
            in_specs=in_specs,
            out_specs=out_spec,
            scratch_shapes=[pltpu.VMEM((S, E), jnp.float32)],   # residual stream
        ),
        compiler_params=pltpu.CompilerParams(
            dimension_semantics=("parallel", "arbitrary"),
            vmem_limit_bytes=vmem_limit),
        cost_estimate=pl.CostEstimate(flops=int(flops),
                                      transcendentals=int(transcendentals),
                                      bytes_accessed=bytes_accessed),
    )(*args)


# ----------------------------------------------------------------- glue -----
def extract_patches(x, pF, pT):
    # x: (B, time, freq). PyTorch does unsqueeze(1).transpose(2,3) -> (B,1,F,T),
    # conv(stride=patch) -> (B,E,nF,nT), flatten(2): patch index = fi*nT + ti,
    # within-patch flatten order = (pf, pt) row-major (matches Conv2d w.view).
    B, T, F = x.shape
    nF, nT = F // pF, T // pT
    x_ft = jnp.transpose(x, (0, 2, 1))                      # (B, F, T)
    x_ft = x_ft.reshape(B, nF, pF, nT, pT)
    return jnp.transpose(x_ft, (0, 1, 3, 2, 4)).reshape(B, nF * nT, pF * pT)


def init_params(key, *, P, E, FF, depth):
    ks = jax.random.split(key, 2 + 4 * depth)
    # Conv2d patch projection: xavier_uniform on the (E, P) view; bias ~ 0.
    limit = math.sqrt(6.0 / (E + P))
    patch_w = jax.random.uniform(ks[0], (P, E), jnp.float32, -limit, limit)

    def nrm(k, shape):
        # trunc_normal std=0.02 (synthetic: plain normal * 0.02)
        return 0.02 * jax.random.normal(k, shape, jnp.float32)

    wqkv = jnp.stack([nrm(ks[2 + 4 * d + 0], (E, 3 * E)) for d in range(depth)])
    wo = jnp.stack([nrm(ks[2 + 4 * d + 1], (E, E)) for d in range(depth)])
    w1 = jnp.stack([nrm(ks[2 + 4 * d + 2], (E, FF)) for d in range(depth)])
    w2 = jnp.stack([nrm(ks[2 + 4 * d + 3], (FF, E)) for d in range(depth)])

    bf16 = jnp.bfloat16
    return {
        # matmul weights stored bf16 (MXU path); LN params / biases stay f32
        "patch_w": patch_w.astype(bf16), "patch_b": jnp.zeros((1, E), jnp.float32),
        "ln1_w": jnp.ones((depth, 1, E), jnp.float32),
        "ln1_b": jnp.zeros((depth, 1, E), jnp.float32),
        "wqkv": wqkv.astype(bf16), "bqkv": jnp.zeros((depth, 1, 3 * E), jnp.float32),
        "wo": wo.astype(bf16), "bo": jnp.zeros((depth, 1, E), jnp.float32),
        "ln2_w": jnp.ones((depth, 1, E), jnp.float32),
        "ln2_b": jnp.zeros((depth, 1, E), jnp.float32),
        "w1": w1.astype(bf16), "b1": jnp.zeros((depth, 1, FF), jnp.float32),
        "w2": w2.astype(bf16), "b2": jnp.zeros((depth, 1, E), jnp.float32),
        "lnf_w": jnp.ones((1, E), jnp.float32),
        "lnf_b": jnp.zeros((1, E), jnp.float32),
    }


def ast_embedder_forward(x, params, pos, cfg):
    pF, pT = cfg["patch_size"]
    B = x.shape[0]
    S, E = cfg["num_patches"], cfg["embed_dim"]
    P = pF * pT
    FF = int(cfg["embed_dim"] * cfg["mlp_ratio"])

    patches = extract_patches(x, pF, pT)                    # (B, S, P)
    return fused_forward(patches, pos, params,
                         B=B, S=S, P=P, E=E, FF=FF,
                         depth=cfg["depth"], num_heads=cfg["num_heads"])


# ----------------------------------------------------------------- main -----
if __name__ == "__main__":
    # Small shapes consistent with ASTEmbedder(input_fdim, input_tdim, patch, E, ...)
    cfg = dict(
        input_fdim=32,       # frequency bins
        input_tdim=64,       # time frames
        patch_size=(16, 16),
        embed_dim=32,
        depth=2,
        num_heads=4,
        mlp_ratio=4.0,
    )
    nF = cfg["input_fdim"] // cfg["patch_size"][0]
    nT = cfg["input_tdim"] // cfg["patch_size"][1]
    cfg["num_patches"] = nF * nT                            # 2 * 4 = 8
    FF = int(cfg["embed_dim"] * cfg["mlp_ratio"])
    P = cfg["patch_size"][0] * cfg["patch_size"][1]

    B = 2
    key = jax.random.PRNGKey(0)
    k_x, k_p, k_pos = jax.random.split(key, 3)

    # x: (batch, time_frames, frequency_bins)
    x = jax.random.normal(k_x, (B, cfg["input_tdim"], cfg["input_fdim"]), jnp.float32)

    params = init_params(k_p, P=P, E=cfg["embed_dim"], FF=FF, depth=cfg["depth"])
    pos_embed = 0.02 * jax.random.normal(
        k_pos, (cfg["num_patches"], cfg["embed_dim"]), jnp.float32)

    out = ast_embedder_forward(x, params, pos_embed, cfg)
    out = jax.block_until_ready(out)

    assert out.shape == (B, cfg["num_patches"], cfg["embed_dim"]), out.shape
    assert out.dtype == jnp.float32
    assert bool(jnp.all(jnp.isfinite(out)))
    print("KERNEL_OK")
</pallas_src>

<mosaic_0001>
module attributes {stable_mosaic.version = 11 : i64} {
  func.func @ast_kernel(%arg0: i32, %arg1: i32, %arg2: memref<1x8x256xf32, #tpu.memory_space<vmem>>, %arg3: memref<8x32xf32, #tpu.memory_space<vmem>>, %arg4: memref<256x32xbf16, #tpu.memory_space<vmem>>, %arg5: memref<1x32xf32, #tpu.memory_space<vmem>>, %arg6: memref<1x1x32xf32, #tpu.memory_space<vmem>>, %arg7: memref<1x1x32xf32, #tpu.memory_space<vmem>>, %arg8: memref<1x32x96xbf16, #tpu.memory_space<vmem>>, %arg9: memref<1x1x96xf32, #tpu.memory_space<vmem>>, %arg10: memref<1x32x32xbf16, #tpu.memory_space<vmem>>, %arg11: memref<1x1x32xf32, #tpu.memory_space<vmem>>, %arg12: memref<1x1x32xf32, #tpu.memory_space<vmem>>, %arg13: memref<1x1x32xf32, #tpu.memory_space<vmem>>, %arg14: memref<1x32x128xbf16, #tpu.memory_space<vmem>>, %arg15: memref<1x1x128xf32, #tpu.memory_space<vmem>>, %arg16: memref<1x128x32xbf16, #tpu.memory_space<vmem>>, %arg17: memref<1x1x32xf32, #tpu.memory_space<vmem>>, %arg18: memref<1x32xf32, #tpu.memory_space<vmem>>, %arg19: memref<1x32xf32, #tpu.memory_space<vmem>>, %arg20: memref<1x8x32xf32, #tpu.memory_space<vmem>>, %arg21: memref<8x32xf32, #tpu.memory_space<vmem>>) attributes {dimension_semantics = [#tpu.dimension_semantics<parallel>, #tpu.dimension_semantics<arbitrary>], iteration_bounds = array<i64: 2, 2>, scalar_prefetch = 0 : i64, scratch_operands = 1 : i64, tpu.core_type = #tpu.core_type<tc>, window_params = [{transform_indices = @transform_0, window_bounds = array<i64: 1, 8, 256>}, {pipeline_mode = #tpu.pipeline_mode<synchronous>, transform_indices = @transform_1, window_bounds = array<i64: 8, 32>}, {pipeline_mode = #tpu.pipeline_mode<synchronous>, transform_indices = @transform_2, window_bounds = array<i64: 256, 32>}, {pipeline_mode = #tpu.pipeline_mode<synchronous>, transform_indices = @transform_3, window_bounds = array<i64: 1, 32>}, {transform_indices = @transform_4, window_bounds = array<i64: 1, 1, 32>}, {transform_indices = @transform_5, window_bounds = array<i64: 1, 1, 32>}, {transform_indices = @transform_6, window_bounds = array<i64: 1, 32, 96>}, {transform_indices = @transform_7, window_bounds = array<i64: 1, 1, 96>}, {transform_indices = @transform_8, window_bounds = array<i64: 1, 32, 32>}, {transform_indices = @transform_9, window_bounds = array<i64: 1, 1, 32>}, {transform_indices = @transform_10, window_bounds = array<i64: 1, 1, 32>}, {transform_indices = @transform_11, window_bounds = array<i64: 1, 1, 32>}, {transform_indices = @transform_12, window_bounds = array<i64: 1, 32, 128>}, {transform_indices = @transform_13, window_bounds = array<i64: 1, 1, 128>}, {transform_indices = @transform_14, window_bounds = array<i64: 1, 128, 32>}, {transform_indices = @transform_15, window_bounds = array<i64: 1, 1, 32>}, {pipeline_mode = #tpu.pipeline_mode<synchronous>, transform_indices = @transform_16, window_bounds = array<i64: 1, 32>}, {pipeline_mode = #tpu.pipeline_mode<synchronous>, transform_indices = @transform_17, window_bounds = array<i64: 1, 32>}, {transform_indices = @transform_18, window_bounds = array<i64: 1, 8, 32>}]} {
    %c0_i32 = arith.constant 0 : i32
    %0 = arith.cmpi eq, %arg1, %c0_i32 : i32
    %1 = arith.extui %0 : i1 to i32
    %c0_i32_0 = arith.constant 0 : i32
    %2 = arith.cmpi ne, %1, %c0_i32_0 : i32
    scf.if %2 {
      %c0_62 = arith.constant 0 : index
      %c0_63 = arith.constant 0 : index
      %c0_64 = arith.constant 0 : index
      %128 = vector.load %arg2[%c0_62, %c0_63, %c0_64] : memref<1x8x256xf32, #tpu.memory_space<vmem>>, vector<1x8x256xf32>
      %129 = vector.shape_cast %128 : vector<1x8x256xf32> to vector<8x256xf32>
      %130 = arith.truncf %129 : vector<8x256xf32> to vector<8x256xbf16>
      %c0_65 = arith.constant 0 : index
      %c0_66 = arith.constant 0 : index
      %131 = vector.load %arg4[%c0_65, %c0_66] : memref<256x32xbf16, #tpu.memory_space<vmem>>, vector<256x32xbf16>
      %cst_67 = arith.constant dense<0.000000e+00> : vector<8x32xf32>
      %132 = tpu.matmul %130, %131, %cst_67 {dimension_numbers = #tpu.dot_dimension_numbers<[1], [0], [0], [1], [0, 0, 1, 1], [], []>} : vector<8x256xbf16>, vector<256x32xbf16>, vector<8x32xf32> -> vector<8x32xf32>
      %c0_68 = arith.constant 0 : index
      %c0_69 = arith.constant 0 : index
      %133 = vector.load %arg5[%c0_68, %c0_69] : memref<1x32xf32, #tpu.memory_space<vmem>>, vector<1x32xf32>
      %134 = vector.broadcast %133 : vector<1x32xf32> to vector<8x32xf32>
      %135 = arith.addf %132, %134 : vector<8x32xf32>
      %c0_70 = arith.constant 0 : index
      %c0_71 = arith.constant 0 : index
      %136 = vector.load %arg3[%c0_70, %c0_71] : memref<8x32xf32, #tpu.memory_space<vmem>>, vector<8x32xf32>
      %137 = arith.addf %135, %136 : vector<8x32xf32>
      %c0_72 = arith.constant 0 : index
      %c0_73 = arith.constant 0 : index
      %138 = vector.load %arg21[%c0_72, %c0_73] : memref<8x32xf32, #tpu.memory_space<vmem>>, vector<8x32xf32>
      tpu.vector_store %arg21[%c0_72, %c0_73], %137 {strides = array<i32>} : memref<8x32xf32, #tpu.memory_space<vmem>>, vector<8x32xf32>,
    } else {
    }
    %c0 = arith.constant 0 : index
    %c0_1 = arith.constant 0 : index
    %3 = vector.load %arg21[%c0, %c0_1] : memref<8x32xf32, #tpu.memory_space<vmem>>, vector<8x32xf32>
    %c0_2 = arith.constant 0 : index
    %c0_3 = arith.constant 0 : index
    %c0_4 = arith.constant 0 : index
    %4 = vector.load %arg6[%c0_2, %c0_3, %c0_4] : memref<1x1x32xf32, #tpu.memory_space<vmem>>, vector<1x1x32xf32>
    %5 = vector.shape_cast %4 : vector<1x1x32xf32> to vector<1x32xf32>
    %c0_5 = arith.constant 0 : index
    %c0_6 = arith.constant 0 : index
    %c0_7 = arith.constant 0 : index
    %6 = vector.load %arg7[%c0_5, %c0_6, %c0_7] : memref<1x1x32xf32, #tpu.memory_space<vmem>>, vector<1x1x32xf32>
    %7 = vector.shape_cast %6 : vector<1x1x32xf32> to vector<1x32xf32>
    %cst = arith.constant dense<0.000000e+00> : vector<8xf32>
    %8 = vector.multi_reduction <add>, %3, %cst [1] : vector<8x32xf32> to vector<8xf32>
    %9 = vector.shape_cast %8 : vector<8xf32> to vector<8x1xf32>
    %cst_8 = arith.constant 3.200000e+01 : f32
    %10 = vector.broadcast %cst_8 : f32 to vector<8x1xf32>
    %11 = arith.divf %9, %10 : vector<8x1xf32>
    %12 = arith.mulf %3, %3 : vector<8x32xf32>
    %cst_9 = arith.constant dense<0.000000e+00> : vector<8xf32>
    %13 = vector.multi_reduction <add>, %12, %cst_9 [1] : vector<8x32xf32> to vector<8xf32>
    %14 = vector.shape_cast %13 : vector<8xf32> to vector<8x1xf32>
    %cst_10 = arith.constant 3.200000e+01 : f32
    %15 = vector.broadcast %cst_10 : f32 to vector<8x1xf32>
    %16 = arith.divf %14, %15 : vector<8x1xf32>
    %17 = arith.mulf %11, %11 : vector<8x1xf32>
    %18 = arith.subf %16, %17 : vector<8x1xf32>
    %19 = vector.broadcast %11 : vector<8x1xf32> to vector<8x32xf32>
    %20 = arith.subf %3, %19 : vector<8x32xf32>
    %cst_11 = arith.constant 9.99999974E-6 : f32
    %21 = vector.broadcast %cst_11 : f32 to vector<8x1xf32>
    %22 = arith.addf %18, %21 : vector<8x1xf32>
    %23 = math.rsqrt %22 : vector<8x1xf32>
    %24 = vector.broadcast %23 : vector<8x1xf32> to vector<8x32xf32>
    %25 = arith.mulf %20, %24 : vector<8x32xf32>
    %26 = vector.broadcast %5 : vector<1x32xf32> to vector<8x32xf32>
    %27 = arith.mulf %25, %26 : vector<8x32xf32>
    %28 = vector.broadcast %7 : vector<1x32xf32> to vector<8x32xf32>
    %29 = arith.addf %27, %28 : vector<8x32xf32>
    %30 = arith.truncf %29 : vector<8x32xf32> to vector<8x32xbf16>
    %c0_12 = arith.constant 0 : index
    %c0_13 = arith.constant 0 : index
    %c0_14 = arith.constant 0 : index
    %31 = vector.load %arg8[%c0_12, %c0_13, %c0_14] : memref<1x32x96xbf16, #tpu.memory_space<vmem>>, vector<1x32x96xbf16>
    %32 = vector.shape_cast %31 : vector<1x32x96xbf16> to vector<32x96xbf16>
    %cst_15 = arith.constant dense<0.000000e+00> : vector<8x96xf32>
    %33 = tpu.matmul %30, %32, %cst_15 {dimension_numbers = #tpu.dot_dimension_numbers<[1], [0], [0], [1], [0, 0, 1, 1], [], []>} : vector<8x32xbf16>, vector<32x96xbf16>, vector<8x96xf32> -> vector<8x96xf32>
    %c0_16 = arith.constant 0 : index
    %c0_17 = arith.constant 0 : index
    %c0_18 = arith.constant 0 : index
    %34 = vector.load %arg9[%c0_16, %c0_17, %c0_18] : memref<1x1x96xf32, #tpu.memory_space<vmem>>, vector<1x1x96xf32>
    %35 = vector.shape_cast %34 : vector<1x1x96xf32> to vector<1x96xf32>
    %36 = vector.broadcast %35 : vector<1x96xf32> to vector<8x96xf32>
    %37 = arith.addf %33, %36 : vector<8x96xf32>
    %38 = vector.extract_strided_slice %37 {offsets = [0, 0], sizes = [8, 32], strides = [1, 1]} : vector<8x96xf32> to vector<8x32xf32>
    %39 = vector.shape_cast %38 : vector<8x32xf32> to vector<8x4x8xf32>
    %40 = arith.truncf %39 : vector<8x4x8xf32> to vector<8x4x8xbf16>
    %41 = vector.extract_strided_slice %37 {offsets = [0, 32], sizes = [8, 32], strides = [1, 1]} : vector<8x96xf32> to vector<8x32xf32>
    %42 = vector.shape_cast %41 : vector<8x32xf32> to vector<8x4x8xf32>
    %43 = arith.truncf %42 : vector<8x4x8xf32> to vector<8x4x8xbf16>
    %44 = vector.extract_strided_slice %37 {offsets = [0, 64], sizes = [8, 32], strides = [1, 1]} : vector<8x96xf32> to vector<8x32xf32>
    %45 = vector.shape_cast %44 : vector<8x32xf32> to vector<8x4x8xf32>
    %46 = arith.truncf %45 : vector<8x4x8xf32> to vector<8x4x8xbf16>
    "tpu.trace_start"() <{level = 10 : i32, message = "qhd,khd->hqk"}> : () -> ()
    %cst_19 = arith.constant dense<0.000000e+00> : vector<4x8x8xf32>
    %47 = tpu.matmul %40, %43, %cst_19 {dimension_numbers = #tpu.dot_dimension_numbers<[2], [2], [0], [0], [0, 1, 0, 0, 1, 0], [1], [1]>} : vector<8x4x8xbf16>, vector<8x4x8xbf16>, vector<4x8x8xf32> -> vector<4x8x8xf32>
    "tpu.trace_stop"() : () -> ()
    %cst_20 = arith.constant 0.353553385 : f32
    %48 = vector.broadcast %cst_20 : f32 to vector<4x8x8xf32>
    %49 = arith.mulf %47, %48 : vector<4x8x8xf32>
    %cst_21 = arith.constant dense<0xFF800000> : vector<4x8xf32>
    %50 = vector.multi_reduction <maximumf>, %49, %cst_21 [2] : vector<4x8x8xf32> to vector<4x8xf32>
    %51 = vector.shape_cast %50 : vector<4x8xf32> to vector<4x8x1xf32>
    %52 = vector.broadcast %51 : vector<4x8x1xf32> to vector<4x8x8xf32>
    %53 = arith.subf %49, %52 : vector<4x8x8xf32>
    %54 = math.exp %53 : vector<4x8x8xf32>
    %cst_22 = arith.constant dense<0.000000e+00> : vector<4x8xf32>
    %55 = vector.multi_reduction <add>, %54, %cst_22 [2] : vector<4x8x8xf32> to vector<4x8xf32>
    %56 = vector.shape_cast %55 : vector<4x8xf32> to vector<4x8x1xf32>
    %57 = tpu.reciprocal %56 {approx = true} : vector<4x8x1xf32> -> vector<4x8x1xf32>
    %58 = vector.broadcast %57 : vector<4x8x1xf32> to vector<4x8x8xf32>
    %59 = arith.mulf %54, %58 : vector<4x8x8xf32>
    %60 = arith.truncf %59 : vector<4x8x8xf32> to vector<4x8x8xbf16>
    "tpu.trace_start"() <{level = 10 : i32, message = "hqk,khd->qhd"}> : () -> ()
    %cst_23 = arith.constant dense<0.000000e+00> : vector<4x8x8xf32>
    %61 = tpu.matmul %46, %60, %cst_23 {dimension_numbers = #tpu.dot_dimension_numbers<[0], [2], [2], [1], [0, 1, 0, 2, 1, 1], [1], [0]>} : vector<8x4x8xbf16>, vector<4x8x8xbf16>, vector<4x8x8xf32> -> vector<4x8x8xf32>
    %62 = tpu.transpose %61, [2, 0, 1] : vector<4x8x8xf32> -> vector<8x4x8xf32>
    "tpu.trace_stop"() : () -> ()
    %63 = vector.shape_cast %62 : vector<8x4x8xf32> to vector<8x32xf32>
    %64 = arith.truncf %63 : vector<8x32xf32> to vector<8x32xbf16>
    %c0_24 = arith.constant 0 : index
    %c0_25 = arith.constant 0 : index
    %c0_26 = arith.constant 0 : index
    %65 = vector.load %arg10[%c0_24, %c0_25, %c0_26] : memref<1x32x32xbf16, #tpu.memory_space<vmem>>, vector<1x32x32xbf16>
    %66 = vector.shape_cast %65 : vector<1x32x32xbf16> to vector<32x32xbf16>
    %cst_27 = arith.constant dense<0.000000e+00> : vector<8x32xf32>
    %67 = tpu.matmul %64, %66, %cst_27 {dimension_numbers = #tpu.dot_dimension_numbers<[1], [0], [0], [1], [0, 0, 1, 1], [], []>} : vector<8x32xbf16>, vector<32x32xbf16>, vector<8x32xf32> -> vector<8x32xf32>
    %c0_28 = arith.constant 0 : index
    %c0_29 = arith.constant 0 : index
    %c0_30 = arith.constant 0 : index
    %68 = vector.load %arg11[%c0_28, %c0_29, %c0_30] : memref<1x1x32xf32, #tpu.memory_space<vmem>>, vector<1x1x32xf32>
    %69 = vector.shape_cast %68 : vector<1x1x32xf32> to vector<1x32xf32>
    %70 = vector.broadcast %69 : vector<1x32xf32> to vector<8x32xf32>
    %71 = arith.addf %67, %70 : vector<8x32xf32>
    %72 = arith.addf %3, %71 : vector<8x32xf32>
    %c0_31 = arith.constant 0 : index
    %c0_32 = arith.constant 0 : index
    %c0_33 = arith.constant 0 : index
    %73 = vector.load %arg12[%c0_31, %c0_32, %c0_33] : memref<1x1x32xf32, #tpu.memory_space<vmem>>, vector<1x1x32xf32>
    %74 = vector.shape_cast %73 : vector<1x1x32xf32> to vector<1x32xf32>
    %c0_34 = arith.constant 0 : index
    %c0_35 = arith.constant 0 : index
    %c0_36 = arith.constant 0 : index
    %75 = vector.load %arg13[%c0_34, %c0_35, %c0_36] : memref<1x1x32xf32, #tpu.memory_space<vmem>>, vector<1x1x32xf32>
    %76 = vector.shape_cast %75 : vector<1x1x32xf32> to vector<1x32xf32>
    %cst_37 = arith.constant dense<0.000000e+00> : vector<8xf32>
    %77 = vector.multi_reduction <add>, %72, %cst_37 [1] : vector<8x32xf32> to vector<8xf32>
    %78 = vector.shape_cast %77 : vector<8xf32> to vector<8x1xf32>
    %cst_38 = arith.constant 3.200000e+01 : f32
    %79 = vector.broadcast %cst_38 : f32 to vector<8x1xf32>
    %80 = arith.divf %78, %79 : vector<8x1xf32>
    %81 = arith.mulf %72, %72 : vector<8x32xf32>
    %cst_39 = arith.constant dense<0.000000e+00> : vector<8xf32>
    %82 = vector.multi_reduction <add>, %81, %cst_39 [1] : vector<8x32xf32> to vector<8xf32>
    %83 = vector.shape_cast %82 : vector<8xf32> to vector<8x1xf32>
    %cst_40 = arith.constant 3.200000e+01 : f32
    %84 = vector.broadcast %cst_40 : f32 to vector<8x1xf32>
    %85 = arith.divf %83, %84 : vector<8x1xf32>
    %86 = arith.mulf %80, %80 : vector<8x1xf32>
    %87 = arith.subf %85, %86 : vector<8x1xf32>
    %88 = vector.broadcast %80 : vector<8x1xf32> to vector<8x32xf32>
    %89 = arith.subf %72, %88 : vector<8x32xf32>
    %cst_41 = arith.constant 9.99999974E-6 : f32
    %90 = vector.broadcast %cst_41 : f32 to vector<8x1xf32>
    %91 = arith.addf %87, %90 : vector<8x1xf32>
    %92 = math.rsqrt %91 : vector<8x1xf32>
    %93 = vector.broadcast %92 : vector<8x1xf32> to vector<8x32xf32>
    %94 = arith.mulf %89, %93 : vector<8x32xf32>
    %95 = vector.broadcast %74 : vector<1x32xf32> to vector<8x32xf32>
    %96 = arith.mulf %94, %95 : vector<8x32xf32>
    %97 = vector.broadcast %76 : vector<1x32xf32> to vector<8x32xf32>
    %98 = arith.addf %96, %97 : vector<8x32xf32>
    %99 = arith.truncf %98 : vector<8x32xf32> to vector<8x32xbf16>
    %c0_42 = arith.constant 0 : index
    %c0_43 = arith.constant 0 : index
    %c0_44 = arith.constant 0 : index
    %100 = vector.load %arg14[%c0_42, %c0_43, %c0_44] : memref<1x32x128xbf16, #tpu.memory_space<vmem>>, vector<1x32x128xbf16>
    %101 = vector.shape_cast %100 : vector<1x32x128xbf16> to vector<32x128xbf16>
    %cst_45 = arith.constant dense<0.000000e+00> : vector<8x128xf32>
    %102 = tpu.matmul %99, %101, %cst_45 {dimension_numbers = #tpu.dot_dimension_numbers<[1], [0], [0], [1], [0, 0, 1, 1], [], []>} : vector<8x32xbf16>, vector<32x128xbf16>, vector<8x128xf32> -> vector<8x128xf32>
    %c0_46 = arith.constant 0 : index
    %c0_47 = arith.constant 0 : index
    %c0_48 = arith.constant 0 : index
    %103 = vector.load %arg15[%c0_46, %c0_47, %c0_48] : memref<1x1x128xf32, #tpu.memory_space<vmem>>, vector<1x1x128xf32>
    %104 = vector.shape_cast %103 : vector<1x1x128xf32> to vector<1x128xf32>
    %105 = vector.broadcast %104 : vector<1x128xf32> to vector<8x128xf32>
    %106 = arith.addf %102, %105 : vector<8x128xf32>
    %cst_49 = arith.constant 5.000000e-01 : f32
    %107 = vector.broadcast %cst_49 : f32 to vector<8x128xf32>
    %108 = arith.mulf %107, %106 : vector<8x128xf32>
    %cst_50 = arith.constant 0.707106769 : f32
    %109 = vector.broadcast %cst_50 : f32 to vector<8x128xf32>
    %110 = arith.mulf %106, %109 : vector<8x128xf32>
    %111 = math.erf %110 : vector<8x128xf32>
    %cst_51 = arith.constant 1.000000e+00 : f32
    %112 = vector.broadcast %cst_51 : f32 to vector<8x128xf32>
    %113 = arith.addf %112, %111 : vector<8x128xf32>
    %114 = arith.mulf %108, %113 : vector<8x128xf32>
    %115 = arith.truncf %114 : vector<8x128xf32> to vector<8x128xbf16>
    %c0_52 = arith.constant 0 : index
    %c0_53 = arith.constant 0 : index
    %c0_54 = arith.constant 0 : index
    %116 = vector.load %arg16[%c0_52, %c0_53, %c0_54] : memref<1x128x32xbf16, #tpu.memory_space<vmem>>, vector<1x128x32xbf16>
    %117 = vector.shape_cast %116 : vector<1x128x32xbf16> to vector<128x32xbf16>
    %cst_55 = arith.constant dense<0.000000e+00> : vector<8x32xf32>
    %118 = tpu.matmul %115, %117, %cst_55 {dimension_numbers = #tpu.dot_dimension_numbers<[1], [0], [0], [1], [0, 0, 1, 1], [], []>} : vector<8x128xbf16>, vector<128x32xbf16>, vector<8x32xf32> -> vector<8x32xf32>
    %c0_56 = arith.constant 0 : index
    %c0_57 = arith.constant 0 : index
    %c0_58 = arith.constant 0 : index
    %119 = vector.load %arg17[%c0_56, %c0_57, %c0_58] : memref<1x1x32xf32, #tpu.memory_space<vmem>>, vector<1x1x32xf32>
    %120 = vector.shape_cast %119 : vector<1x1x32xf32> to vector<1x32xf32>
    %121 = vector.broadcast %120 : vector<1x32xf32> to vector<8x32xf32>
    %122 = arith.addf %118, %121 : vector<8x32xf32>
    %123 = arith.addf %72, %122 : vector<8x32xf32>
    %c0_59 = arith.constant 0 : index
    %c0_60 = arith.constant 0 : index
    %124 = vector.load %arg21[%c0_59, %c0_60] : memref<8x32xf32, #tpu.memory_space<vmem>>, vector<8x32xf32>
    tpu.vector_store %arg21[%c0_59, %c0_60], %123 {strides = array<i32>} : memref<8x32xf32, #tpu.memory_space<vmem>>, vector<8x32xf32>,
    %c1_i32 = arith.constant 1 : i32
    %125 = arith.cmpi eq, %arg1, %c1_i32 : i32
    %126 = arith.extui %125 : i1 to i32
    %c0_i32_61 = arith.constant 0 : i32
    %127 = arith.cmpi ne, %126, %c0_i32_61 : i32
    scf.if %127 {
      %c0_62 = arith.constant 0 : index
      %c0_63 = arith.constant 0 : index
      %128 = vector.load %arg21[%c0_62, %c0_63] : memref<8x32xf32, #tpu.memory_space<vmem>>, vector<8x32xf32>
      %c0_64 = arith.constant 0 : index
      %c0_65 = arith.constant 0 : index
      %129 = vector.load %arg18[%c0_64, %c0_65] : memref<1x32xf32, #tpu.memory_space<vmem>>, vector<1x32xf32>
      %c0_66 = arith.constant 0 : index
      %c0_67 = arith.constant 0 : index
      %130 = vector.load %arg19[%c0_66, %c0_67] : memref<1x32xf32, #tpu.memory_space<vmem>>, vector<1x32xf32>
      %cst_68 = arith.constant dense<0.000000e+00> : vector<8xf32>
      %131 = vector.multi_reduction <add>, %128, %cst_68 [1] : vector<8x32xf32> to vector<8xf32>
      %132 = vector.shape_cast %131 : vector<8xf32> to vector<8x1xf32>
      %cst_69 = arith.constant 3.200000e+01 : f32
      %133 = vector.broadcast %cst_69 : f32 to vector<8x1xf32>
      %134 = arith.divf %132, %133 : vector<8x1xf32>
      %135 = arith.mulf %128, %128 : vector<8x32xf32>
      %cst_70 = arith.constant dense<0.000000e+00> : vector<8xf32>
      %136 = vector.multi_reduction <add>, %135, %cst_70 [1] : vector<8x32xf32> to vector<8xf32>
      %137 = vector.shape_cast %136 : vector<8xf32> to vector<8x1xf32>
      %cst_71 = arith.constant 3.200000e+01 : f32
      %138 = vector.broadcast %cst_71 : f32 to vector<8x1xf32>
      %139 = arith.divf %137, %138 : vector<8x1xf32>
      %140 = arith.mulf %134, %134 : vector<8x1xf32>
      %141 = arith.subf %139, %140 : vector<8x1xf32>
      %142 = vector.broadcast %134 : vector<8x1xf32> to vector<8x32xf32>
      %143 = arith.subf %128, %142 : vector<8x32xf32>
      %cst_72 = arith.constant 9.99999974E-6 : f32
      %144 = vector.broadcast %cst_72 : f32 to vector<8x1xf32>
      %145 = arith.addf %141, %144 : vector<8x1xf32>
      %146 = math.rsqrt %145 : vector<8x1xf32>
      %147 = vector.broadcast %146 : vector<8x1xf32> to vector<8x32xf32>
      %148 = arith.mulf %143, %147 : vector<8x32xf32>
      %149 = vector.broadcast %129 : vector<1x32xf32> to vector<8x32xf32>
      %150 = arith.mulf %148, %149 : vector<8x32xf32>
      %151 = vector.broadcast %130 : vector<1x32xf32> to vector<8x32xf32>
      %152 = arith.addf %150, %151 : vector<8x32xf32>
      %c0_73 = arith.constant 0 : index
      %c0_74 = arith.constant 0 : index
      %c0_75 = arith.constant 0 : index
      %153 = vector.load %arg20[%c0_73, %c0_74, %c0_75] : memref<1x8x32xf32, #tpu.memory_space<vmem>>, vector<1x8x32xf32>
      %154 = vector.shape_cast %153 : vector<1x8x32xf32> to vector<8x32xf32>
      %155 = vector.shape_cast %152 : vector<8x32xf32> to vector<1x8x32xf32>
      tpu.vector_store %arg20[%c0_73, %c0_74, %c0_75], %155 {strides = array<i32>} : memref<1x8x32xf32, #tpu.memory_space<vmem>>, vector<1x8x32xf32>,
    } else {
    }
    return
  }
  func.func @transform_0(%arg0: i32, %arg1: i32) -> (i32, i32, i32) {
    %c0_i32 = arith.constant 0 : i32
    %c0_i32_0 = arith.constant 0 : i32
    %c0_i32_1 = arith.constant 0 : i32
    return %arg0, %c0_i32, %c0_i32_0 : i32, i32, i32
  }
  func.func @transform_1(%arg0: i32, %arg1: i32) -> (i32, i32) {
    %c0_i32 = arith.constant 0 : i32
    %c0_i32_0 = arith.constant 0 : i32
    %c0_i32_1 = arith.constant 0 : i32
    return %c0_i32, %c0_i32_0 : i32, i32
  }
  func.func @transform_2(%arg0: i32, %arg1: i32) -> (i32, i32) {
    %c0_i32 = arith.constant 0 : i32
    %c0_i32_0 = arith.constant 0 : i32
    %c0_i32_1 = arith.constant 0 : i32
    return %c0_i32, %c0_i32_0 : i32, i32
  }
  func.func @transform_3(%arg0: i32, %arg1: i32) -> (i32, i32) {
    %c0_i32 = arith.constant 0 : i32
    %c0_i32_0 = arith.constant 0 : i32
    %c0_i32_1 = arith.constant 0 : i32
    return %c0_i32, %c0_i32_0 : i32, i32
  }
  func.func @transform_4(%arg0: i32, %arg1: i32) -> (i32, i32, i32) {
    %c0_i32 = arith.constant 0 : i32
    %c0_i32_0 = arith.constant 0 : i32
    %c0_i32_1 = arith.constant 0 : i32
    return %arg1, %c0_i32, %c0_i32_0 : i32, i32, i32
  }
  func.func @transform_5(%arg0: i32, %arg1: i32) -> (i32, i32, i32) {
    %c0_i32 = arith.constant 0 : i32
    %c0_i32_0 = arith.constant 0 : i32
    %c0_i32_1 = arith.constant 0 : i32
    return %arg1, %c0_i32, %c0_i32_0 : i32, i32, i32
  }
  func.func @transform_6(%arg0: i32, %arg1: i32) -> (i32, i32, i32) {
    %c0_i32 = arith.constant 0 : i32
    %c0_i32_0 = arith.constant 0 : i32
    %c0_i32_1 = arith.constant 0 : i32
    return %arg1, %c0_i32, %c0_i32_0 : i32, i32, i32
  }
  func.func @transform_7(%arg0: i32, %arg1: i32) -> (i32, i32, i32) {
    %c0_i32 = arith.constant 0 : i32
    %c0_i32_0 = arith.constant 0 : i32
    %c0_i32_1 = arith.constant 0 : i32
    return %arg1, %c0_i32, %c0_i32_0 : i32, i32, i32
  }
  func.func @transform_8(%arg0: i32, %arg1: i32) -> (i32, i32, i32) {
    %c0_i32 = arith.constant 0 : i32
    %c0_i32_0 = arith.constant 0 : i32
    %c0_i32_1 = arith.constant 0 : i32
    return %arg1, %c0_i32, %c0_i32_0 : i32, i32, i32
  }
  func.func @transform_9(%arg0: i32, %arg1: i32) -> (i32, i32, i32) {
    %c0_i32 = arith.constant 0 : i32
    %c0_i32_0 = arith.constant 0 : i32
    %c0_i32_1 = arith.constant 0 : i32
    return %arg1, %c0_i32, %c0_i32_0 : i32, i32, i32
  }
  func.func @transform_10(%arg0: i32, %arg1: i32) -> (i32, i32, i32) {
    %c0_i32 = arith.constant 0 : i32
    %c0_i32_0 = arith.constant 0 : i32
    %c0_i32_1 = arith.constant 0 : i32
    return %arg1, %c0_i32, %c0_i32_0 : i32, i32, i32
  }
  func.func @transform_11(%arg0: i32, %arg1: i32) -> (i32, i32, i32) {
    %c0_i32 = arith.constant 0 : i32
    %c0_i32_0 = arith.constant 0 : i32
    %c0_i32_1 = arith.constant 0 : i32
    return %arg1, %c0_i32, %c0_i32_0 : i32, i32, i32
  }
  func.func @transform_12(%arg0: i32, %arg1: i32) -> (i32, i32, i32) {
    %c0_i32 = arith.constant 0 : i32
    %c0_i32_0 = arith.constant 0 : i32
    %c0_i32_1 = arith.constant 0 : i32
    return %arg1, %c0_i32, %c0_i32_0 : i32, i32, i32
  }
  func.func @transform_13(%arg0: i32, %arg1: i32) -> (i32, i32, i32) {
    %c0_i32 = arith.constant 0 : i32
    %c0_i32_0 = arith.constant 0 : i32
    %c0_i32_1 = arith.constant 0 : i32
    return %arg1, %c0_i32, %c0_i32_0 : i32, i32, i32
  }
  func.func @transform_14(%arg0: i32, %arg1: i32) -> (i32, i32, i32) {
    %c0_i32 = arith.constant 0 : i32
    %c0_i32_0 = arith.constant 0 : i32
    %c0_i32_1 = arith.constant 0 : i32
    return %arg1, %c0_i32, %c0_i32_0 : i32, i32, i32
  }
  func.func @transform_15(%arg0: i32, %arg1: i32) -> (i32, i32, i32) {
    %c0_i32 = arith.constant 0 : i32
    %c0_i32_0 = arith.constant 0 : i32
    %c0_i32_1 = arith.constant 0 : i32
    return %arg1, %c0_i32, %c0_i32_0 : i32, i32, i32
  }
  func.func @transform_16(%arg0: i32, %arg1: i32) -> (i32, i32) {
    %c0_i32 = arith.constant 0 : i32
    %c0_i32_0 = arith.constant 0 : i32
    %c0_i32_1 = arith.constant 0 : i32
    return %c0_i32, %c0_i32_0 : i32, i32
  }
  func.func @transform_17(%arg0: i32, %arg1: i32) -> (i32, i32) {
    %c0_i32 = arith.constant 0 : i32
    %c0_i32_0 = arith.constant 0 : i32
    %c0_i32_1 = arith.constant 0 : i32
    return %c0_i32, %c0_i32_0 : i32, i32
  }
  func.func @transform_18(%arg0: i32, %arg1: i32) -> (i32, i32, i32) {
    %c0_i32 = arith.constant 0 : i32
    %c0_i32_0 = arith.constant 0 : i32
    %c0_i32_1 = arith.constant 0 : i32
    return %arg0, %c0_i32, %c0_i32_0 : i32, i32, i32
  }
}

</mosaic_0001>

<bundles_post_ra>
// kernel: tpu_custom_call.1
= control target key start
LH: loop header
LB: loop body
LE: loop exit
PB: predicated region body
PF: predicated region fallthrough
CT: control target
= control target key end

     0   :  { %s4591_s0 = inlined_call_operand.vmem [shape: f32[2,8,256], index: 0, kind: input, shape index: {}]   ;;  %s4592_s1 = inlined_call_operand.vmem [shape: f32[8,32], index: 1, kind: input, shape index: {}]   ;;  %s4593_s2 = inlined_call_operand.vmem [shape: bf16[256,32], index: 2, kind: input, shape index: {}]   ;;  %s4594_s3 = inlined_call_operand.vmem [shape: f32[1,32], index: 3, kind: input, shape index: {}]   ;;  %s4595_s4 = inlined_call_operand.vmem [shape: f32[2,1,32], index: 4, kind: input, shape index: {}]   ;;  %s4596_s5 = inlined_call_operand.vmem [shape: f32[2,1,32], index: 5, kind: input, shape index: {}]   ;;  %s4597_s6 = inlined_call_operand.vmem [shape: bf16[2,32,96], index: 6, kind: input, shape index: {}]   ;;  %s4598_s7 = inlined_call_operand.vmem [shape: f32[2,1,96], index: 7, kind: input, shape index: {}]   ;;  %s4599_s8 = inlined_call_operand.vmem [shape: bf16[2,32,32], index: 8, kind: input, shape index: {}]   ;;  %s4600_s9 = inlined_call_operand.vmem [shape: f32[2,1,32], index: 9, kind: input, shape index: {}]   ;;  %s4601_s10 = inlined_call_operand.vmem [shape: f32[2,1,32], index: 10, kind: input, shape index: {}]   ;;  %s4602_s11 = inlined_call_operand.vmem [shape: f32[2,1,32], index: 11, kind: input, shape index: {}]   ;;  %s4603_s12 = inlined_call_operand.vmem [shape: bf16[2,32,128], index: 12, kind: input, shape index: {}]   ;;  %s4604_s13 = inlined_call_operand.vmem [shape: f32[2,1,128], index: 13, kind: input, shape index: {}]   ;;  %s4605_s14 = inlined_call_operand.vmem [shape: bf16[2,128,32], index: 14, kind: input, shape index: {}]   ;;  %s4606_s15 = inlined_call_operand.vmem [shape: f32[2,1,32], index: 15, kind: input, shape index: {}]   ;;  %s4607_s16 = inlined_call_operand.vmem [shape: f32[1,32], index: 16, kind: input, shape index: {}]   ;;  %s4608_s17 = inlined_call_operand.vmem [shape: f32[1,32], index: 17, kind: input, shape index: {}]   ;;  %s4609_s18 = inlined_call_operand.hbm [shape: f32[2,8,32], index: 18, kind: output, shape index: {}]  }
   0x1   :  { %4626 = sst [smem:[#allocation19_spill]] %s4591_s0 }
   0x2   :  { %4627 = sst [smem:[#allocation20_spill]] %s4592_s1 }
   0x3   :  { %4628 = sst [smem:[#allocation21_spill]] %s4593_s2 }
   0x4   :  { %4629 = sst [smem:[#allocation22_spill]] %s4594_s3 }
   0x5   :  { %4630 = sst [smem:[#allocation23_spill]] %s4596_s5 }
   0x6   :  { %4631 = sst [smem:[#allocation24_spill]] %s4597_s6 }
   0x7   :  { %4632 = sst [smem:[#allocation25_spill]] %s4599_s8 }
   0x8   :  { %4633 = sst [smem:[#allocation26_spill]] %s4607_s16 }
   0x9   :  { %4634 = sst [smem:[#allocation27_spill]] %s4608_s17 }
   0xa   :  { %4635 = sst [smem:[#allocation28_spill]] %s4609_s18 }
   0xb   :  { %23 = vsyncpa [#allocation4], 0 }
   0xc   :  { %25 = vsyncpa [#allocation4 + $0x1], 0  ;;  %s4033_s27 = smov 0   ;;  %s4035_s28 = smov 0  }
   0xd   :  { %s4037_s29 = smov 0   ;;  %s4039_s30 = smov 0  }
   0xe   :  { %s4041_s0 = smov 0   ;;  %s4043_s19 = smov 0  }
   0xf   :  { %s4045_s1 = smov 0   ;;  %s4047_s20 = smov 0  }
  0x10 LB: > { %4636 = sst [smem:[#allocation6_spill]] %s3894_s27  ;;  %s3456_s21 = sadd.s32 4294967295, %s3922_s20   ;;  %s3922_s20 = sphi %s4047_s20, %s31_s20   ;;  %s3918_s1 = sphi %s4045_s1, %s4685_s1   ;;  %s3914_s19 = sphi %s4043_s19, %s4684_s19   ;;  %s3910_s0 = sphi %s4041_s0, %s4683_s0   ;;  %s3906_s30 = sphi %s4039_s30, %s4682_s30   ;;  %s3902_s29 = sphi %s4037_s29, %s4681_s29   ;;  %s3898_s28 = sphi %s4035_s28, %s4680_s28   ;;  %s3894_s27 = sphi %s4033_s27, %s4679_s27  }
  0x11   : > { %4637 = sst [smem:[#allocation7_spill]] %s3898_s28  ;;  %s3457_s22 = sadd.s32 4294967294, %s3922_s20  }
  0x12   : > { %4638 = sst [smem:[#allocation8_spill]] %s3902_s29  ;;  %s40_s2 = sadd.s32 1, %s3914_s19 }
  0x13   : > { %4639 = sst [smem:[#allocation9_spill]] %s3906_s30  ;;  %p41_p0 = scmp.ge.s32.totalorder %s40_s2, 2 }
  0x14   : > { %4640 = sst [smem:[#allocation10_spill]] %s3910_s0  ;;  %s43_s23 = sadd.s32 1, %s3918_s1 }
  0x15   : > { %4641 = sst [smem:[#allocation11_spill]] %s3914_s19  ;;  %p503_p1 = scmp.ne.s32.totalorder %s3902_s29, %s3898_s28 }
  0x16   : > { %4642 = sst [smem:[#allocation12_spill]] %s3918_s1  ;;  %p504_p2 = scmp.eq.s32.totalorder %s3456_s21, 3 }
  0x17   : > { %4643 = sst [smem:[#allocation13_spill]] %s3922_s20  ;;  %s4687_s2 = smov (%p41_p0, %s40_s2), 0 }
  0x18   : > { %4644 = sst [smem:[#allocation14_spill]] %s4687_s2  ;;  %s4689_s23 = smov (!%p41_p0, %s43_s23), %s3918_s1 }
  0x19   : > { %p4082_p3 = por %p504_p2, %p503_p1  ;;  %p509_p4 = scmp.ne.s32.totalorder %s3898_s28, %s3894_s27 }
  0x1a   : > { %p45_p5 = scmp.ge.s32.totalorder %s4689_s23, 2  ;;  %p510_p6 = scmp.eq.s32.totalorder %s3457_s22, 3 }
  0x1b   : > { %s4645_s24 = scalar_select %p4082_p3, 1, 0 }
  0x1c   : > { %p3460_p7 = scmp.ge.s32.totalorder %s3922_s20, 1  ;;  %p631_p8 = scmp.lt.s32.totalorder %s3922_s20, 5 }
  0x1d   : > { %4646 = sst [smem:[#allocation15_spill]] %s4645_s24  ;;  %s4691_s23 = smov (%p45_p5, %s4689_s23), 0 }
  0x1e   : > { %4647 = sst [smem:[#allocation16_spill]] %s4691_s23  ;;  %p4092_p9 = por %p510_p6, %p509_p4 }
  0x1f   : > { %p632_p10 = pnand %p3460_p7, %p631_p8  ;;  %s490_s26 = ssub.s32 %s3918_s1, %s4691_s23 }
  0x20   : > { %s4648_s25 = scalar_select %p4092_p9, 1, 0 }
  0x21   : > { %s493_s21 = sadd.s32 1, %s3902_s29  ;;  %p491_p11 = scmp.eq.s32.totalorder %s490_s26, 0 }
  0x22   : > { %4649 = sst [smem:[#allocation17_spill]] %s4648_s25  ;;  %635 = sbr.rel (%p632_p10) target bundleno = 3534 (0xdce), region = 92 }
  0x23   : > { %s4100_s2 = scalar_select %p491_p11, %s3902_s29, %s493_s21  }
  0x24   : > { %s4616_s22 = sand.u32 (!%p632_p10), 1, %s3898_s28   ;;  %p729_p12 = scmp.lt.s32.totalorder (!%p632_p10), %s3910_s0, 1 }
  0x25   : > { %4650 = sst [smem:[#allocation18_spill]] %s4100_s2  ;;  %s4106_s19 = sshll.u32 (!%p632_p10), %s4616_s22, 3 }
  0x26   : > { %p734_p13 = scmp.lt.s32.totalorder (!%p632_p10), %s3906_s30, 1  ;;  %s4651_s1 = sld [smem:[#allocation19_spill]] (!%p632_p10) }
  0x27   : > { %s4653_s6 = sld [smem:[#allocation24_spill]] (!%p632_p10)  ;;  %s4654_s8 = sld [smem:[#allocation25_spill]] (!%p632_p10) }
  0x28   : > { %s728_s16 = scalar_lea.vmem (!%p632_p10), [#allocation3], %s4106_s19  ;;  %s4655_s17 = sld [smem:[#allocation9_spill]] (!%p632_p10) }
  0x29   : > { %s730_s25 = scalar_select %p729_p12, %s3910_s0, 1 }
  0x2a   : > { %s4111_s27 = scalar_select %p734_p13, %s3906_s30, 1 }
  0x2b   : > { %s3536_s26 = sshll.u32 %s730_s25, 4 }
  0x2c   : > { %s4116_s22 = scalar_lea.vmem %s4651_s1, %s3536_s26  ;;  %s3537_s0 = sshll.u32 %s4111_s27, 4 }
  0x2d   : > { %s4130_s3 = scalar_lea.vmem %s4653_s6, %s3537_s0  ;;  %s4139_s21 = scalar_lea.vmem %s4654_s8, %s3537_s0 }
  0x2e   : > { %s4156_s25 = scalar_lea.vmem %s4603_s12, %s3537_s0  ;;  %s769_s23 = scalar_lea.vmem %s4604_s13, %s4111_s27 }
  0x2f   : > { %s3540_s8 = sshll.u32 %s4111_s27, 6  ;;  %s777_s18 = scalar_lea.vmem %s4606_s15, %s4111_s27 }
  0x30   : > { %s4170_s20 = scalar_lea.vmem %s4605_s14, %s3540_s8  ;;  %p3472_p0 = scmp.ne.s32.totalorder %s4655_s17, 0 }
  0x31   : > { %s4656_s30 = sld [smem:[#allocation21_spill]] (!%p3472_p0)  ;;  %v784_v11 = vld [vmem:[%s4116_s22 + $0x8] sm:$0xff] (!%p3472_p0)  ;;  %v783_v18 = vld [vmem:[%s4116_s22] sm:$0xff] (!%p3472_p0)  ;;  %s4659_s29 = sld [smem:[#allocation20_spill]] (!%p3472_p0)  ;;  %vm964_vm0 = vcmask (!%p3472_p0), 261120  }
  0x32   : > { %782 = sbr.rel (%p3472_p0) target bundleno = 308 (0x134), region = 96  ;;  %v786_v12 = vpack.c.bf16 (!%p3472_p0), %v784_v11, %v784_v11  ;;  %v785_v19 = vpack.c.bf16 (!%p3472_p0), %v783_v18, %v783_v18 }
  0x34   : > { %954 = vmatprep.mubr.bf16.mxu0 (!%p3472_p0), %v786_v12 }
  0x37   : > { %s4657_s6 = smov (!%p3472_p0), %s4656_s30  ;;  %v3773_v0 = vld [vmem:[%s4656_s30 + $0x40] sm:$0xff] (!%p3472_p0)   ;;  %s4658_s30 = sld [smem:[#allocation22_spill]] (!%p3472_p0) }
  0x38   : > { %v3774_v1 = vld [vmem:[%s4657_s6] sm:$0xff] (!%p3472_p0)   ;;  %3541 = vmatprep.subr.bf16.mxu0 (!%p3472_p0), %v3773_v0  ;;  %v3775_v2 = vld [vmem:[%s4657_s6 + $0x48] sm:$0xff] (!%p3472_p0)   ;;  %v3777_v4 = vld [vmem:[%s4657_s6 + $0x50] sm:$0xff] (!%p3472_p0)  }
  0x39   : > { %3542 = vmatpush3.bf16.msra.mxu0 %v3774_v1  ;;  %v3776_v3 = vld [vmem:[%s4657_s6 + $0x8] sm:$0xff]   ;;  %v3778_v5 = vld [vmem:[%s4657_s6 + $0x10] sm:$0xff]   ;;  %v3779_v6 = vld [vmem:[%s4657_s6 + $0x58] sm:$0xff]  }
  0x3a   : > { %3543 = vmatprep.subr.bf16.mxu0 %v3775_v2  ;;  %v3780_v7 = vld [vmem:[%s4657_s6 + $0x18] sm:$0xff]   ;;  %v3781_v8 = vld [vmem:[%s4657_s6 + $0x60] sm:$0xff]   ;;  %v3783_v10 = vld [vmem:[%s4657_s6 + $0x68] sm:$0xff]  }
  0x3b   : > { %v3782_v9 = vld [vmem:[%s4657_s6 + $0x20] sm:$0xff]   ;;  %v3784_v13 = vld [vmem:[%s4657_s6 + $0x28] sm:$0xff]   ;;  %v3785_v14 = vld [vmem:[%s4657_s6 + $0x70] sm:$0xff]  }
  0x3c   : > { %v3786_v15 = vld [vmem:[%s4657_s6 + $0x30] sm:$0xff]   ;;  %v3787_v16 = vld [vmem:[%s4657_s6 + $0x78] sm:$0xff]   ;;  %v962_v25 = vld [vmem:[%s4659_s29] sm:$0xff] }
  0x3d   : > { %3544 = vmatpush3.bf16.msra.mxu0 %v3776_v3  ;;  %v3788_v17 = vld [vmem:[%s4657_s6 + $0x38] sm:$0xff]   ;;  %v3473_v21 = vld [vmem:[%s4658_s30] ss:$0 sm:$0xff] }
  0x3e   : > { %3545 = vmatprep.subr.bf16.mxu0 %v3777_v4 }
  0x41   : > { %3546 = vmatpush3.bf16.msra.mxu0 %v3778_v5 }
  0x42   : > { %3547 = vmatprep.subr.bf16.mxu0 %v3779_v6 }
  0x45   : > { %3548 = vmatpush3.bf16.msra.mxu0 %v3780_v7 }
  0x46   : > { %3549 = vmatprep.subr.bf16.mxu0 %v3781_v8 }
  0x49   : > { %3550 = vmatpush3.bf16.msra.mxu0 %v3782_v9 }
  0x4a   : > { %3551 = vmatprep.subr.bf16.mxu0 %v3783_v10 }
  0x4d   : > { %3552 = vmatpush3.bf16.msra.mxu0 %v3784_v13 }
  0x4e   : > { %3553 = vmatprep.subr.bf16.mxu0 %v3785_v14 }
  0x51   : > { %3554 = vmatpush3.bf16.msra.mxu0 %v3786_v15 }
  0x52   : > { %3555 = vmatprep.subr.bf16.mxu0 %v3787_v16 }
  0x55   : > { %3556 = vmatpush3.bf16.msra.mxu0 %v3788_v17 }
  0x58   : > { %955 = vmatmul.mubr.bf16.vlgmr.msra.gmra.mrb[0].mxu0 %v785_v19 }
 0x12b   : > { %v3557_v20 = vpop.f32.mrb[0].mxu0 }
 0x12c   : > { %v3558_v22 = vpop.f32.mrb[1].mxu0 }
 0x12d   : > { %v3559_v23 = vadd.f32 %v3558_v22, %v3557_v20  ;;  %v3560_v24 = vpop.f32.mrb[2].mxu0 }
 0x12e   : > { %v3561_v26 = vpop.f32.mrb[3].mxu0 }
 0x12f   : > { %v957_v27 = vadd.f32 %v3559_v23, %v3473_v21 }
 0x131   : > { %v963_v28 = vadd.f32 %v962_v25, %v957_v27 }
 0x133   : > { %965 = vst.msk [vmem:[#allocation2] sm:$0xff] %vm964_vm0, %v963_v28 }
 0x134 PF: > { %vm969_vm1 = vcmask 261120   ;;  %v3789_v33 = vld [vmem:[%s4130_s3] sm:$0xff]   ;;  %v3924_v34 = vmov 0.0   ;;  %vm3925_vm2 = vmmov 0   ;;  %v3790_v35 = vld [vmem:[%s4130_s3 + $0x8] sm:$0xff]   ;;  %s4660_s2 = scalar_lea.vmem %s4595_s4, %s4111_s27  ;;  %s4661_s24 = sld [smem:[#allocation23_spill]]  ;;  %v1082_v63 = vlaneseq }
 0x135   : > { %3597 = vmatprep.subr.bf16.mxu1 %v3924_v34  ;;  %3601 = vmatprep.mubr.msk.bf16.mxu1 %vm3925_vm2, %v3924_v34  ;;  %v3490_v45 = vld [vmem:[%s4660_s2] ss:$0 sm:$0xff]  ;;  %s4663_s30 = scalar_lea.vmem %s4598_s7, %s4111_s27  ;;  %s3926_s1 = smov 104   ;;  %v3930_v61 = vmov 1983009808   ;;  %vm1813_vm3 = vcmask 1043456  }
 0x136   : > { %3598 = vmatpush3.bf16.msra.mxu1 %v3789_v33  ;;  %3617 = vmatprep.subr.bf16.mxu0 %v3924_v34  ;;  %v3492_v51 = vld [vmem:[%s4663_s30] ss:$0 sm:$0xff]  ;;  %s3927_s26 = smov 120   ;;  %s3928_s29 = smov 112   ;;  %v1080_v62 = vunpack.c.l.s4 %v3930_v61  ;;  %v1083_v2 = vshrl.u32 %v1082_v63, 7  ;;  %vm1809_vm4 = vcmask 64512  }
 0x137   : > { %3599 = vmatprep.subr.bf16.mxu1 %v3924_v34  ;;  %3619 = vmatprep.mubr.msk.bf16.mxu0 %vm3925_vm2, %v3924_v34  ;;  %s3929_s3 = smov 96   ;;  %v3931_v4 = vmov 1934713408   ;;  %s3933_s22 = smov 64   ;;  %vm2926_vm5 = vcmask 130048   ;;  %vm2928_vm6 = vcmask 195584  }
 0x138   : > { %v1081_v1 = vunpack.c.0.s8 %v1080_v62  ;;  %v1112_v5 = vunpack.c.l.s4 %v3931_v4  ;;  %s3935_s2 = smov 8   ;;  %s3936_s8 = smov 24  }
 0x139   : > { %s4665_s0 = scalar_lea.vmem %s4601_s10, %s4111_s27 }
 0x13a   : > { %v966_v29 = vld [vmem:[#allocation2] sm:$0xff]  ;;  %3600 = vmatpush3.bf16.msra.mxu1 %v3790_v35  ;;  %s4662_s17 = scalar_lea.vmem %s4661_s24, %s4111_s27  ;;  %v4275_v7 = vsub.s32 %v1081_v1, %v1083_v2  ;;  %v1113_v9 = vunpack.c.0.s8 %v1112_v5 }
 0x13b   : > { %v970_v30 = vsel %vm969_vm1, %v966_v29, 0.0  ;;  %v975_v31 = vmul.f32 %v966_v29, %v966_v29  ;;  %3605 = vmatprep.subr.bf16.mxu1 %v3924_v34  ;;  %v3491_v47 = vld [vmem:[%s4662_s17] ss:$0 sm:$0xff]  ;;  %s4664_s17 = scalar_lea.vmem %s4600_s9, %s4111_s27 }
 0x13c   : > { %971 = vadd.xlane.f32.xlu0 %v970_v30  ;;  %v4280_v16 = vsub.s32 %v1113_v9, %v1083_v2  ;;  %v3932_v9 = vmov 0  }
 0x13d   : > { %v976_v32 = vsel %vm969_vm1, %v975_v31, 0.0 }
 0x140   : > { %977 = vadd.xlane.f32.xlu0 %v976_v32 }
 0x1c9   : > { %v972_v36 = vpop.xlane.xlu0 %971 }
 0x1ca   : > { %v974_v37 = vmul.f32 0.03125, %v972_v36 }
 0x1cc   : > { %v980_v39 = vmul.f32 %v974_v37, %v974_v37  ;;  %v982_v43 = vsub.f32 %v966_v29, %v974_v37 }
 0x1cd   : > { %v978_v38 = vpop.xlane.xlu0 %977 }
 0x1ce   : > { %v979_v40 = vmul.f32 0.03125, %v978_v38 }
 0x1d0   : > { %v981_v41 = vsub.f32 %v979_v40, %v980_v39 }
 0x1d2   : > { %v983_v42 = vadd.f32 1e-05, %v981_v41 }
 0x1d4   : > { %3803 = vrsqrt.f32 %v983_v42 }
 0x1de   : > { %v3804_v44 = vpop.eup %3803 }
 0x1df   : > { %v985_v46 = vmul.f32 %v3804_v44, %v982_v43 }
 0x1e1   : > { %v992_v48 = vmul.f32 %v3490_v45, %v985_v46 }
 0x1e3   : > { %v999_v49 = vadd.f32 %v3491_v47, %v992_v48 }
 0x1e5   : > { %v1000_v50 = vpack.c.bf16 %v999_v49, %v999_v49 }
 0x1e7   : > { %3602 = vmatmul.mubr.msk.bf16.vlgmr.msra.gmra.mrb[0].mxu1 %vm969_vm1, %v1000_v50 }
 0x1e8   : > { %3607 = vmatprep.mubr.msk.bf16.mxu1 %vm3925_vm2, %v3924_v34 }
 0x2ba   : > { %v1061_v52 = vpop.f32.mrb[0].mxu1 }
 0x2bb   : > { %v4260_v53 = vadd.f32 %v3492_v51, %v1061_v52  ;;  %v3603_v54 = vpop.f32.mrb[1].mxu1 }
 0x2bc   : > { %v1064_v55 = vpop.f32.mrb[2].mxu1 }
 0x2bd   : > { %1074 = vrot.lane.b32.xlu0 %v4260_v53, %s3926_s1  ;;  %1068 = vrot.lane.b32.xlu1 %v4260_v53, %s3927_s26  ;;  %v3604_v56 = vpop.f32.mrb[3].mxu1  ;;  %s4666_s26 = scalar_lea.vmem %s4602_s11, %s4111_s27 }
 0x2c1   : > { %1071 = vrot.lane.b32.xlu1 %v4260_v53, %s3928_s29 }
 0x2c5   : > { %1153 = vrot.lane.b32.xlu1 %v4260_v53, %s3929_s3 }
 0x32f   : > { %v4266_v57 = vpop.permute.xlu1 %1068  ;;  %v4272_v59 = vpop.permute.xlu0 %1074 }
 0x330   : > { %1155 = vrot.lane.b32.xlu1 %v4266_v57, %s3929_s3 }
 0x333   : > { %v4269_v58 = vpop.permute.xlu1 %1071 }
 0x334   : > { %1157 = vrot.lane.b32.xlu1 %v4269_v58, %s3929_s3 }
 0x337   : > { %v1154_v60 = vpop.permute.xlu1 %1153 }
 0x338   : > { %1159 = vrot.lane.b32.xlu1 %v4272_v59, %s3929_s3 }
 0x3a2   : > { %v1156_v0 = vpop.permute.xlu1 %1155 }
 0x3a6   : > { %v1158_v3 = vpop.permute.xlu1 %1157 }
 0x3a7   : > { %v1165_v6 = vcombine.low %v1154_v60, %v1158_v3  ;;  %v1166_v10 = vcombine.high %v1154_v60, %v1158_v3 }
 0x3a9   : > { %v1173_v13 = vrot.slane %v1165_v6, %v4275_v7  ;;  %v1180_v17 = vrot.slane %v1166_v10, %v4275_v7 }
 0x3aa   : > { %v1160_v8 = vpop.permute.xlu1 %1159 }
 0x3ab   : > { %v1181_v11 = vcombine.low %v1156_v0, %v1160_v8  ;;  %v1182_v12 = vcombine.high %v1156_v0, %v1160_v8 }
 0x3ad   : > { %v1189_v14 = vrot.slane %v1181_v11, %v4275_v7  ;;  %v1196_v15 = vrot.slane %v1182_v12, %v4275_v7 }
 0x3af   : > { %v1197_v18 = vcombine.low %v1173_v13, %v1189_v14  ;;  %v1198_v19 = vcombine.high %v1173_v13, %v1189_v14  ;;  %v1213_v22 = vcombine.low %v1180_v17, %v1196_v15  ;;  %v1214_v28 = vcombine.high %v1180_v17, %v1196_v15 }
 0x3b1   : > { %v1205_v20 = vrot.slane %v1197_v18, %v4280_v16  ;;  %v1212_v21 = vrot.slane %v1198_v19, %v4280_v16  ;;  %v1221_v27 = vrot.slane %v1213_v22, %v4280_v16  ;;  %v1228_v32 = vrot.slane %v1214_v28, %v4280_v16 }
 0x3b2   : > { %v1093_v28 = vcombine.low %v4266_v57, %v4272_v59 }
 0x3b3   : > { %v1233_v23 = vpack.c.bf16 %v1205_v20, %v1205_v20  ;;  %v1229_v24 = vcombine.high %v1205_v20, %v3924_v34  ;;  %v1230_v26 = vcombine.high %v1212_v21, %v3924_v34  ;;  %v1235_v29 = vpack.c.bf16 %v1212_v21, %v1212_v21 }
 0x3b4   : > { %v1231_v31 = vcombine.high %v1221_v27, %v3924_v34  ;;  %v1237_v33 = vpack.c.bf16 %v1221_v27, %v1221_v27  ;;  %v1232_v36 = vcombine.high %v1228_v32, %v3924_v34  ;;  %v1239_v37 = vpack.c.bf16 %v1228_v32, %v1228_v32 }
 0x3b5   : > { %1391 = vxpose.xlu1.c.b16.start.end [1/1] (short) (narrow) %v1233_v23, 16  ;;  %v1234_v25 = vpack.c.bf16 %v1229_v24, %v1229_v24  ;;  %v1236_v30 = vpack.c.bf16 %v1230_v26, %v1230_v26  ;;  %v1077_v26 = vcombine.low %v4260_v53, %v4269_v58  ;;  %v1078_v27 = vcombine.high %v4260_v53, %v4269_v58 }
 0x3b6   : > { %v1238_v35 = vpack.c.bf16 %v1231_v31, %v1231_v31  ;;  %v1240_v38 = vpack.c.bf16 %v1232_v36, %v1232_v36  ;;  %v1101_v32 = vrot.slane %v1093_v28, %v4275_v7 }
 0x3b7   : > { %1407 = vxpose.xlu0.c.b16.start.end [1/1] (short) (narrow) %v1234_v25, 16  ;;  %v1092_v31 = vrot.slane %v1078_v27, %v4275_v7 }
 0x3b9   : > { %1423 = vxpose.xlu1.c.b16.start.end [1/1] (short) (narrow) %v1235_v29, 16  ;;  %v1094_v29 = vcombine.high %v4266_v57, %v4272_v59 }
 0x3bb   : > { %1439 = vxpose.xlu0.c.b16.start.end [1/1] (short) (narrow) %v1236_v30, 16  ;;  %v1085_v30 = vrot.slane %v1077_v26, %v4275_v7 }
 0x3bd   : > { %1455 = vxpose.xlu1.c.b16.start.end [1/1] (short) (narrow) %v1237_v33, 16  ;;  %v1108_v33 = vrot.slane %v1094_v29, %v4275_v7  ;;  %v1110_v36 = vcombine.high %v1085_v30, %v1101_v32 }
 0x3bf   : > { %1471 = vxpose.xlu0.c.b16.start.end [1/1] (short) (narrow) %v1238_v35, 16  ;;  %v1109_v35 = vcombine.low %v1085_v30, %v1101_v32 }
 0x3c1   : > { %1487 = vxpose.xlu1.c.b16.start.end [1/1] (short) (narrow) %v1239_v37, 16  ;;  %v1125_v37 = vcombine.low %v1092_v31, %v1108_v33 }
 0x3c3   : > { %1503 = vxpose.xlu0.c.b16.start.end [1/1] (short) (narrow) %v1240_v38, 16  ;;  %v1126_v38 = vcombine.high %v1092_v31, %v1108_v33 }
 0x41b   : > { %v1399_v39 = vpop.trf.xlu1 }
 0x41d   : > { %v1415_v40 = vpop.trf.xlu0 }
 0x41f   : > { %v1431_v41 = vpop.trf.xlu1 }
 0x421   : > { %v1447_v42 = vpop.trf.xlu0 }
 0x423   : > { %v1463_v43 = vpop.trf.xlu1 }
 0x424   : > { %v1519_v45 = vcombine.low %v1399_v39, %v1463_v43 }
 0x425   : > { %v1479_v44 = vpop.trf.xlu0 }
 0x426   : > { %v1553_v47 = vcombine.low %v1415_v40, %v1479_v44  ;;  %v1526_v50 = vrot.slane %v1519_v45, %v4275_v7  ;;  %v1133_v40 = vrot.slane %v1125_v37, %v4280_v16 }
 0x427   : > { %v1495_v46 = vpop.trf.xlu1 }
 0x428   : > { %v1527_v48 = vcombine.low %v1431_v41, %v1495_v46  ;;  %v1560_v54 = vrot.slane %v1553_v47, %v4275_v7  ;;  %v1143_v45 = vcombine.high %v1133_v40, %v3924_v34 }
 0x429   : > { %v1511_v49 = vpop.trf.xlu0 }
 0x42a   : > { %v1534_v51 = vrot.slane %v1527_v48, %v4275_v7  ;;  %v1561_v52 = vcombine.low %v1447_v42, %v1511_v49 }
 0x42c   : > { %v1535_v55 = vcombine.low %v1526_v50, %v1534_v51  ;;  %v1568_v56 = vrot.slane %v1561_v52, %v4275_v7  ;;  %v1536_v60 = vcombine.high %v1526_v50, %v1534_v51 }
 0x42e   : > { %v1569_v61 = vcombine.low %v1560_v54, %v1568_v56  ;;  %v1570_v62 = vcombine.high %v1560_v54, %v1568_v56  ;;  %v1543_v63 = vrot.slane %v1535_v55, %v4280_v16  ;;  %v1550_v5 = vrot.slane %v1536_v60, %v4280_v16 }
 0x430   : > { %v1577_v0 = vrot.slane %v1569_v61, %v4280_v16  ;;  %v1584_v1 = vrot.slane %v1570_v62, %v4280_v16  ;;  %v1591_v3 = vshrl.u32 %v1543_v63, 16  ;;  %v1607_v12 = vshrl.u32 %v1550_v5, 16 }
 0x431   : > { %v1551_v13 = vcombine.high %v1543_v63, %v3932_v9  ;;  %v1552_v20 = vcombine.high %v1550_v5, %v3932_v9 }
 0x432   : > { %v1589_v2 = vpack.i.b16 %v1577_v0, %v1543_v63  ;;  %v1592_v4 = vshrl.u32 %v1577_v0, 16  ;;  %v1608_v8 = vshrl.u32 %v1584_v1, 16  ;;  %v1585_v10 = vcombine.high %v1577_v0, %v3932_v9 }
 0x433   : > { %v1605_v11 = vpack.i.b16 %v1584_v1, %v1550_v5  ;;  %v1586_v17 = vcombine.high %v1584_v1, %v3932_v9  ;;  %v1599_v19 = vshrl.u32 %v1551_v13, 16  ;;  %v1615_v24 = vshrl.u32 %v1552_v20, 16 }
 0x434   : > { %1619 = vxpose.xlu1.c.b16.start.end [1/1] (short) (narrow) %v1589_v2, 16  ;;  %v1593_v6 = vpack.i.b16 %v1592_v4, %v1591_v3  ;;  %v1609_v14 = vpack.i.b16 %v1608_v8, %v1607_v12  ;;  %v1600_v15 = vshrl.u32 %v1585_v10, 16  ;;  %v1597_v18 = vpack.i.b16 %v1585_v10, %v1551_v13 }
 0x435   : > { %v1616_v22 = vshrl.u32 %v1586_v17, 16  ;;  %v1613_v23 = vpack.i.b16 %v1586_v17, %v1552_v20 }
 0x436   : > { %1635 = vxpose.xlu0.c.b16.start.end [1/1] (short) (narrow) %v1593_v6, 16  ;;  %v1601_v21 = vpack.i.b16 %v1600_v15, %v1599_v19 }
 0x437   : > { %v1617_v25 = vpack.i.b16 %v1616_v22, %v1615_v24 }
 0x438   : > { %1683 = vxpose.xlu1.c.b16.start.end [1/1] (short) (narrow) %v1605_v11, 16 }
 0x43a   : > { %1699 = vxpose.xlu0.c.b16.start.end [1/1] (short) (narrow) %v1609_v14, 16 }
 0x43c   : > { %1651 = vxpose.xlu1.c.b16.start.end [1/1] (short) (narrow) %v1597_v18, 16 }
 0x43e   : > { %1667 = vxpose.xlu0.c.b16.start.end [1/1] (short) (narrow) %v1601_v21, 16 }
 0x440   : > { %1715 = vxpose.xlu1.c.b16.start.end [1/1] (short) (narrow) %v1613_v23, 16 }
 0x442   : > { %1731 = vxpose.xlu0.c.b16.start.end [1/1] (short) (narrow) %v1617_v25, 16 }
 0x444   : > { %1241 = vrot.lane.b32.xlu1 %v4260_v53, %s3933_s22  ;;  %v1117_v53 = vrot.slane %v1109_v35, %v4280_v16 }
 0x446   : > { %v1141_v43 = vcombine.high %v1117_v53, %v3924_v34  ;;  %v3496_v51 = vpack.c.bf16 %v1133_v40, %v1117_v53 }
 0x448   : > { %1245 = vrot.lane.b32.xlu1 %v4269_v58, %s3933_s22  ;;  %v1124_v58 = vrot.slane %v1110_v36, %v4280_v16  ;;  %v3498_v49 = vpack.c.bf16 %v1143_v45, %v1141_v43  ;;  %v1336_v0 = vrot.slane %v3496_v51, %v4275_v7 }
 0x44a   : > { %v1142_v44 = vcombine.high %v1124_v58, %v3924_v34  ;;  %v1361_v60 = vrot.slane %v3498_v49, %v4275_v7 }
 0x44b   : > { %1243 = vrot.lane.b32.xlu0 %v4266_v57, %s3933_s22  ;;  %v1140_v57 = vrot.slane %v1126_v38, %v4280_v16 }
 0x44d   : > { %v1144_v46 = vcombine.high %v1140_v57, %v3924_v34  ;;  %v3497_v52 = vpack.c.bf16 %v1140_v57, %v1124_v58 }
 0x44f   : > { %v3499_v50 = vpack.c.bf16 %v1144_v46, %v1142_v44  ;;  %v1344_v1 = vrot.slane %v3497_v52, %v4275_v7 }
 0x451   : > { %v1369_v61 = vrot.slane %v3499_v50, %v4275_v7  ;;  %v1345_v12 = vcombine.low %v1336_v0, %v1344_v1 }
 0x453   : > { %v1370_v11 = vcombine.low %v1361_v60, %v1369_v61  ;;  %v1352_v19 = vrot.slane %v1345_v12, %v4280_v16 }
 0x455   : > { %v1377_v17 = vrot.slane %v1370_v11, %v4280_v16  ;;  %v1353_v30 = vcombine.high %v1352_v19, %v3932_v9  ;;  %v1382_v37 = vshrl.u32 %v1352_v19, 16 }
 0x457   : > { %v1378_v27 = vcombine.high %v1377_v17, %v3932_v9  ;;  %v1381_v29 = vpack.i.b16 %v1377_v17, %v1352_v19  ;;  %v1383_v36 = vshrl.u32 %v1377_v17, 16  ;;  %v1388_v40 = vshrl.u32 %v1353_v30, 16 }
 0x459   : > { %v1387_v33 = vpack.i.b16 %v1378_v27, %v1353_v30  ;;  %v1389_v58 = vshrl.u32 %v1378_v27, 16 }
 0x45b   : > { %v1390_v57 = vpack.i.b16 %v1389_v58, %v1388_v40 }
 0x49a   : > { %v1627_v39 = vpop.trf.xlu1 }
 0x49c   : > { %v1643_v41 = vpop.trf.xlu0 }
 0x49e   : > { %v1691_v42 = vpop.trf.xlu1 }
 0x49f   : > { %v1747_v55 = vcombine.low %v1627_v39, %v1691_v42  ;;  %v1384_v39 = vpack.i.b16 %v1383_v36, %v1382_v37 }
 0x4a0   : > { %v1707_v47 = vpop.trf.xlu0 }
 0x4a1   : > { %v1772_v62 = vcombine.low %v1643_v41, %v1707_v47  ;;  %v1754_v3 = vrot.slane %v1747_v55, %v4275_v7 }
 0x4a2   : > { %v1659_v48 = vpop.trf.xlu1 }
 0x4a3   : > { %v1779_v6 = vrot.slane %v1772_v62, %v4275_v7 }
 0x4a4   : > { %v1675_v54 = vpop.trf.xlu0 }
 0x4a6   : > { %v1723_v56 = vpop.trf.xlu1 }
 0x4a7   : > { %v1755_v63 = vcombine.low %v1659_v48, %v1723_v56 }
 0x4a8   : > { %v1739_v2 = vpop.trf.xlu0 }
 0x4a9   : > { %v1762_v4 = vrot.slane %v1755_v63, %v4275_v7  ;;  %v1780_v5 = vcombine.low %v1675_v54, %v1739_v2 }
 0x4ab   : > { %v1763_v8 = vcombine.low %v1754_v3, %v1762_v4  ;;  %v1787_v10 = vrot.slane %v1780_v5, %v4275_v7 }
 0x4ad   : > { %v1770_v13 = vrot.slane %v1763_v8, %v4280_v16  ;;  %v1788_v14 = vcombine.low %v1779_v6, %v1787_v10 }
 0x4af   : > { %v1795_v15 = vrot.slane %v1788_v14, %v4280_v16  ;;  %v1771_v18 = vcombine.high %v1770_v13, %v3932_v9  ;;  %v1800_v22 = vshrl.u32 %v1770_v13, 16 }
 0x4b1   : > { %v1799_v20 = vpack.i.b16 %v1795_v15, %v1770_v13  ;;  %v1796_v21 = vcombine.high %v1795_v15, %v3932_v9  ;;  %v1801_v23 = vshrl.u32 %v1795_v15, 16  ;;  %v1806_v35 = vshrl.u32 %v1771_v18, 16 }
 0x4b3   : > { %v1815_v24 = vsel %vm1813_vm3, %v1799_v20, 0  ;;  %v1805_v25 = vpack.i.b16 %v1796_v21, %v1771_v18  ;;  %v1802_v26 = vpack.i.b16 %v1801_v23, %v1800_v22  ;;  %v1807_v31 = vshrl.u32 %v1796_v21, 16 }
 0x4b4   : > { %3606 = vmatpush3.bf16.msra.mxu1 %v1815_v24 }
 0x4b5   : > { %v1907_v28 = vsel %vm1813_vm3, %v1805_v25, 0  ;;  %3611 = vmatprep.subr.bf16.mxu1 %v3924_v34  ;;  %v1861_v32 = vsel %vm1813_vm3, %v1802_v26, 0  ;;  %v1808_v38 = vpack.i.b16 %v1807_v31, %v1806_v35 }
 0x4b6   : > { %3618 = vmatpush3.bf16.msra.mxu0 %v1907_v28  ;;  %v1242_v1 = vpop.permute.xlu1 %1241 }
 0x4b7   : > { %3608 = vmatmul.mubr.msk.bf16.vlgmr.msra.gmra.mrb[4].mxu1 %vm1809_vm4, %v1381_v29  ;;  %3629 = vmatprep.subr.bf16.mxu0 %v3924_v34  ;;  %v1953_v53 = vsel %vm1813_vm3, %v1808_v38, 0 }
 0x4b8   : > { %3612 = vmatpush3.bf16.msra.mxu1 %v1861_v32  ;;  %3613 = vmatprep.mubr.msk.bf16.mxu1 %vm3925_vm2, %v3924_v34 }
 0x4b9   : > { %3620 = vmatmul.mubr.msk.bf16.vlgmr.msra.gmra.mrb[0].mxu0 %vm1809_vm4, %v1387_v33  ;;  %3623 = vmatprep.subr.bf16.mxu1 %v3924_v34 }
 0x4ba   : > { %3631 = vmatprep.mubr.msk.bf16.mxu0 %vm3925_vm2, %v3924_v34  ;;  %v1246_v2 = vpop.permute.xlu1 %1245 }
 0x4bb   : > { %v1253_v4 = vcombine.low %v1242_v1, %v1246_v2  ;;  %v1254_v8 = vcombine.high %v1242_v1, %v1246_v2 }
 0x4bd   : > { %v1244_v5 = vpop.permute.xlu0 %1243  ;;  %v1261_v12 = vrot.slane %v1253_v4, %v4275_v7  ;;  %v1268_v14 = vrot.slane %v1254_v8, %v4275_v7 }
 0x4bf   : > { %3614 = vmatmul.mubr.msk.bf16.vlgmr.msra.gmra.mrb[8].mxu1 %vm1809_vm4, %v1384_v39 }
 0x4c0   : > { %3624 = vmatpush3.bf16.msra.mxu1 %v1953_v53  ;;  %3625 = vmatprep.mubr.msk.bf16.mxu1 %vm3925_vm2, %v3924_v34 }
 0x4c1   : > { %3635 = vmatprep.subr.bf16.mxu1 %v3924_v34 }
 0x4c7   : > { %3626 = vmatmul.mubr.msk.bf16.vlgmr.msra.gmra.mrb[12].mxu1 %vm1809_vm4, %v1390_v57 }
 0x4c8   : > { %3637 = vmatprep.mubr.msk.bf16.mxu1 %vm3925_vm2, %v3924_v34 }
 0x58a   : > { %v1851_v41 = vpop.f32.mrb[4].mxu1 }
 0x58b   : > { %v4365_v42 = vmul.f32 0.35355338, %v1851_v41  ;;  %v3609_v43 = vpop.f32.mrb[5].mxu1 }
 0x58c   : > { %v1854_v44 = vpop.f32.mrb[6].mxu1  ;;  %v1943_v45 = vpop.f32.mrb[0].mxu0 }
 0x58d   : > { %v3610_v46 = vpop.f32.mrb[7].mxu1  ;;  %v3621_v47 = vpop.f32.mrb[1].mxu0  ;;  %v1999_v48 = vsel %vm1809_vm4, %v4365_v42, -inf  ;;  %v4371_v63 = vmul.f32 0.35355338, %v1943_v45 }
 0x58e   : > { %v1946_v49 = vpop.f32.mrb[2].mxu0  ;;  %2000 = vmax.xlane.f32.xlu1 %v1999_v48 }
 0x58f   : > { %v3622_v50 = vpop.f32.mrb[3].mxu0  ;;  %v2005_v0 = vsel %vm1809_vm4, %v4371_v63, -inf }
 0x592   : > { %v1897_v51 = vpop.f32.mrb[8].mxu1 }
 0x593   : > { %v3615_v52 = vpop.f32.mrb[9].mxu1  ;;  %v4385_v26 = vmul.f32 0.35355338, %v1897_v51 }
 0x594   : > { %v1900_v54 = vpop.f32.mrb[10].mxu1 }
 0x595   : > { %v3616_v55 = vpop.f32.mrb[11].mxu1  ;;  %v2002_v28 = vsel %vm1809_vm4, %v4385_v26, -inf }
 0x59a   : > { %v1989_v56 = vpop.f32.mrb[12].mxu1 }
 0x59b   : > { %v3627_v60 = vpop.f32.mrb[13].mxu1  ;;  %v4390_v32 = vmul.f32 0.35355338, %v1989_v56 }
 0x59c   : > { %v1992_v61 = vpop.f32.mrb[14].mxu1 }
 0x59d   : > { %v3628_v62 = vpop.f32.mrb[15].mxu1  ;;  %v2008_v33 = vsel %vm1809_vm4, %v4390_v32, -inf }
 0x59f   : > { %1247 = vrot.lane.b32.xlu1 %v4272_v59, %s3933_s22 }
 0x5c3   : > { %2006 = vmax.xlane.f32.xlu1 %v2005_v0 }
 0x61b   : > { %v4375_v3 = vpop.xlane.xlu1 %2000 }
 0x61f   : > { %v1248_v6 = vpop.permute.xlu1 %1247 }
 0x620   : > { %v1269_v10 = vcombine.low %v1244_v5, %v1248_v6  ;;  %v1270_v11 = vcombine.high %v1244_v5, %v1248_v6 }
 0x622   : > { %v1277_v59 = vrot.slane %v1269_v10, %v4275_v7  ;;  %v1284_v13 = vrot.slane %v1270_v11, %v4275_v7 }
 0x624   : > { %v1285_v15 = vcombine.low %v1261_v12, %v1277_v59  ;;  %v1301_v18 = vcombine.low %v1268_v14, %v1284_v13  ;;  %v1302_v23 = vcombine.high %v1268_v14, %v1284_v13  ;;  %v1286_v29 = vcombine.high %v1261_v12, %v1277_v59 }
 0x625   : > { %v2011_v59 = vsub.f32 %v4365_v42, %v4375_v3 }
 0x626   : > { %v1293_v17 = vrot.slane %v1285_v15, %v4280_v16  ;;  %v1309_v22 = vrot.slane %v1301_v18, %v4280_v16  ;;  %v1316_v25 = vrot.slane %v1302_v23, %v4280_v16  ;;  %v1300_v30 = vrot.slane %v1286_v29, %v4280_v16 }
 0x628   : > { %v1321_v19 = vpack.c.bf16 %v1293_v17, %v1293_v17  ;;  %v1317_v20 = vcombine.high %v1293_v17, %v3924_v34  ;;  %v1325_v24 = vpack.c.bf16 %v1309_v22, %v1309_v22  ;;  %v1327_v27 = vpack.c.bf16 %v1316_v25, %v1316_v25 }
 0x629   : > { %v1323_v31 = vpack.c.bf16 %v1300_v30, %v1300_v30  ;;  %v1318_v35 = vcombine.high %v1300_v30, %v3924_v34  ;;  %v1319_v37 = vcombine.high %v1309_v22, %v3924_v34  ;;  %v1320_v39 = vcombine.high %v1316_v25, %v3924_v34 }
 0x62a   : > { %2047 = vxpose.xlu0.c.b16.start.end [1/1] (short) (narrow) %v1321_v19, 16  ;;  %v1322_v21 = vpack.c.bf16 %v1317_v20, %v1317_v20 }
 0x62b   : > { %v1324_v36 = vpack.c.bf16 %v1318_v35, %v1318_v35  ;;  %v1326_v38 = vpack.c.bf16 %v1319_v37, %v1319_v37  ;;  %v1328_v53 = vpack.c.bf16 %v1320_v39, %v1320_v39 }
 0x62c   : > { %2063 = vxpose.xlu1.c.b16.start.end [1/1] (short) (narrow) %v1322_v21, 16  ;;  %v2015_v21 = vmul.f32 1.442695, %v2011_v59 }
 0x62e   : > { %3805 = vpow2.f32 %v2015_v21 }
 0x630   : > { %2111 = vxpose.xlu1.c.b16.start.end [1/1] (short) (narrow) %v1325_v24, 16 }
 0x634   : > { %2143 = vxpose.xlu1.c.b16.start.end [1/1] (short) (narrow) %v1327_v27, 16 }
 0x637   : > { %2003 = vmax.xlane.f32.xlu0 %v2002_v28 }
 0x638   : > { %v3806_v30 = vpop.eup %3805 }
 0x650   : > { %v2007_v58 = vpop.xlane.xlu1 %2006 }
 0x651   : > { %v2013_v22 = vsub.f32 %v4371_v63, %v2007_v58 }
 0x653   : > { %v2019_v28 = vmul.f32 1.442695, %v2013_v22 }
 0x664   : > { %2079 = vxpose.xlu0.c.b16.start.end [1/1] (short) (narrow) %v1323_v31, 16  ;;  %v2023_v31 = vsel %vm1809_vm4, %v3806_v30, 0.0 }
 0x671   : > { %2009 = vmax.xlane.f32.xlu0 %v2008_v33 }
 0x690   : > { %v2055_v40 = vpop.trf.xlu0 }
 0x692   : > { %v2071_v57 = vpop.trf.xlu1 }
 0x696   : > { %v2119_v43 = vpop.trf.xlu1 }
 0x697   : > { %v2175_v47 = vcombine.low %v2055_v40, %v2119_v43 }
 0x699   : > { %v2182_v50 = vrot.slane %v2175_v47, %v4275_v7 }
 0x69a   : > { %v2151_v46 = vpop.trf.xlu1 }
 0x69e   : > { %2095 = vxpose.xlu0.c.b16.start.end [1/1] (short) (narrow) %v1324_v36, 16 }
 0x6a2   : > { %2127 = vxpose.xlu0.c.b16.start.end [1/1] (short) (narrow) %v1326_v38, 16 }
 0x6a6   : > { %2159 = vxpose.xlu0.c.b16.start.end [1/1] (short) (narrow) %v1328_v53, 16 }
 0x6c4   : > { %v2004_v41 = vpop.xlane.xlu0 %2003 }
 0x6c5   : > { %v2012_v17 = vsub.f32 %v4385_v26, %v2004_v41 }
 0x6c7   : > { %v2017_v25 = vmul.f32 1.442695, %v2012_v17 }
 0x6c9   : > { %3807 = vpow2.f32 %v2017_v25 }
 0x6ca   : > { %v2087_v44 = vpop.trf.xlu0  ;;  %3809 = vpow2.f32 %v2019_v28 }
 0x6cb   : > { %v2183_v48 = vcombine.low %v2087_v44, %v2151_v46 }
 0x6cd   : > { %v2190_v51 = vrot.slane %v2183_v48, %v4275_v7 }
 0x6cf   : > { %v2191_v55 = vcombine.low %v2182_v50, %v2190_v51  ;;  %v2192_v5 = vcombine.high %v2182_v50, %v2190_v51 }
 0x6d1   : > { %v2199_v0 = vrot.slane %v2191_v55, %v4280_v16  ;;  %v2206_v20 = vrot.slane %v2192_v5, %v4280_v16 }
 0x6d3   : > { %v2247_v6 = vshrl.u32 %v2199_v0, 16  ;;  %v2207_v11 = vcombine.high %v2199_v0, %v3932_v9  ;;  %v2263_v27 = vshrl.u32 %v2206_v20, 16  ;;  %v3808_v63 = vpop.eup %3807  ;;  %v2208_v39 = vcombine.high %v2206_v20, %v3932_v9 }
 0x6d4   : > { %v3810_v33 = vpop.eup %3809 }
 0x6d5   : > { %v2255_v19 = vshrl.u32 %v2207_v11, 16  ;;  %v2029_v36 = vsel %vm1809_vm4, %v3810_v33, 0.0  ;;  %v2271_v40 = vshrl.u32 %v2208_v39, 16 }
 0x6fe   : > { %v2010_v45 = vpop.xlane.xlu0 %2009 }
 0x6ff   : > { %v2014_v42 = vsub.f32 %v4390_v32, %v2010_v45  ;;  %v2026_v32 = vsel %vm1809_vm4, %v3808_v63, 0.0 }
 0x701   : > { %v2021_v29 = vmul.f32 1.442695, %v2014_v42 }
 0x703   : > { %3811 = vpow2.f32 %v2021_v29 }
 0x704   : > { %v2103_v49 = vpop.trf.xlu0 }
 0x708   : > { %v2135_v52 = vpop.trf.xlu0 }
 0x709   : > { %v2209_v54 = vcombine.low %v2071_v57, %v2135_v52 }
 0x70b   : > { %v2216_v61 = vrot.slane %v2209_v54, %v4275_v7 }
 0x70c   : > { %v2167_v56 = vpop.trf.xlu0 }
 0x70d   : > { %v2217_v60 = vcombine.low %v2103_v49, %v2167_v56  ;;  %v3812_v35 = vpop.eup %3811 }
 0x70e   : > { %v2032_v37 = vsel %vm1809_vm4, %v3812_v35, 0.0 }
 0x70f   : > { %v2224_v62 = vrot.slane %v2217_v60, %v4275_v7 }
 0x711   : > { %v2225_v1 = vcombine.low %v2216_v61, %v2224_v62  ;;  %v2226_v2 = vcombine.high %v2216_v61, %v2224_v62 }
 0x713   : > { %v2233_v4 = vrot.slane %v2225_v1, %v4280_v16  ;;  %v2240_v15 = vrot.slane %v2226_v2, %v4280_v16 }
 0x715   : > { %v2245_v8 = vpack.i.b16 %v2233_v4, %v2199_v0  ;;  %v2248_v10 = vshrl.u32 %v2233_v4, 16  ;;  %v2241_v12 = vcombine.high %v2233_v4, %v3932_v9  ;;  %v2264_v24 = vshrl.u32 %v2240_v15, 16 }
 0x716   : > { %v2261_v3 = vpack.i.b16 %v2240_v15, %v2206_v20  ;;  %v2242_v38 = vcombine.high %v2240_v15, %v3932_v9 }
 0x717   : > { %2275 = vxpose.xlu1.c.b16.start.end [1/1] (short) (narrow) %v2245_v8, 16  ;;  %v2249_v13 = vpack.i.b16 %v2248_v10, %v2247_v6  ;;  %v2256_v14 = vshrl.u32 %v2241_v12, 16  ;;  %v2253_v18 = vpack.i.b16 %v2241_v12, %v2207_v11  ;;  %v2265_v26 = vpack.i.b16 %v2264_v24, %v2263_v27 }
 0x718   : > { %v2272_v53 = vshrl.u32 %v2242_v38, 16  ;;  %v2269_v58 = vpack.i.b16 %v2242_v38, %v2208_v39 }
 0x719   : > { %2291 = vxpose.xlu0.c.b16.start.end [1/1] (short) (narrow) %v2249_v13, 16  ;;  %v2257_v23 = vpack.i.b16 %v2256_v14, %v2255_v19 }
 0x71a   : > { %v2273_v57 = vpack.i.b16 %v2272_v53, %v2271_v40 }
 0x71b   : > { %2307 = vxpose.xlu1.c.b16.start.end [1/1] (short) (narrow) %v2253_v18, 16 }
 0x71d   : > { %2323 = vxpose.xlu0.c.b16.start.end [1/1] (short) (narrow) %v2257_v23, 16 }
 0x71f   : > { %2339 = vxpose.xlu1.c.b16.start.end [1/1] (short) (narrow) %v2261_v3, 16 }
 0x721   : > { %2355 = vxpose.xlu0.c.b16.start.end [1/1] (short) (narrow) %v2265_v26, 16 }
 0x72c   : > { %2024 = vadd.xlane.f32.xlu1 %v2023_v31 }
 0x72e   : > { %2027 = vadd.xlane.f32.xlu0 %v2026_v32 }
 0x730   : > { %2030 = vadd.xlane.f32.xlu1 %v2029_v36 }
 0x732   : > { %2033 = vadd.xlane.f32.xlu0 %v2032_v37 }
 0x75d   : > { %2371 = vxpose.xlu1.c.b16.start.end [1/1] (short) (narrow) %v2269_v58, 16 }
 0x75f   : > { %2387 = vxpose.xlu0.c.b16.start.end [1/1] (short) (narrow) %v2273_v57, 16 }
 0x77d   : > { %v2283_v41 = vpop.trf.xlu1 }
 0x77f   : > { %v2299_v43 = vpop.trf.xlu0 }
 0x781   : > { %v2315_v44 = vpop.trf.xlu1 }
 0x783   : > { %v2331_v45 = vpop.trf.xlu0 }
 0x785   : > { %v2347_v46 = vpop.trf.xlu1 }
 0x786   : > { %v2403_v52 = vcombine.low %v2283_v41, %v2347_v46 }
 0x787   : > { %v2363_v47 = vpop.trf.xlu0 }
 0x788   : > { %v2428_v56 = vcombine.low %v2299_v43, %v2363_v47  ;;  %v2410_v1 = vrot.slane %v2403_v52, %v4275_v7 }
 0x78a   : > { %v2435_v10 = vrot.slane %v2428_v56, %v4275_v7 }
 0x7b9   : > { %v2025_v48 = vpop.xlane.xlu1 %2024 }
 0x7ba   : > { %3813 = vrcp.f32 %v2025_v48 }
 0x7bb   : > { %v2028_v49 = vpop.xlane.xlu0 %2027 }
 0x7bc   : > { %3815 = vrcp.f32 %v2028_v49 }
 0x7bd   : > { %v2031_v50 = vpop.xlane.xlu1 %2030 }
 0x7be   : > { %3817 = vrcp.f32 %v2031_v50 }
 0x7bf   : > { %v2034_v51 = vpop.xlane.xlu0 %2033 }
 0x7c0   : > { %3819 = vrcp.f32 %v2034_v51 }
 0x7c3   : > { %v2379_v54 = vpop.trf.xlu1 }
 0x7c4   : > { %v3814_v55 = vpop.eup %3813  ;;  %v2411_v60 = vcombine.low %v2315_v44, %v2379_v54 }
 0x7c5   : > { %v2395_v61 = vpop.trf.xlu0  ;;  %v2039_v62 = vmul.f32 %v3814_v55, %v3806_v30 }
 0x7c6   : > { %v3816_v0 = vpop.eup %3815  ;;  %v2418_v2 = vrot.slane %v2411_v60, %v4275_v7  ;;  %v2436_v4 = vcombine.low %v2331_v45, %v2395_v61 }
 0x7c7   : > { %v2043_v5 = vpack.c.bf16 %v2039_v62, %v2039_v62  ;;  %v2040_v6 = vmul.f32 %v3816_v0, %v3808_v63 }
 0x7c8   : > { %v3818_v8 = vpop.eup %3817  ;;  %v2419_v11 = vcombine.low %v2410_v1, %v2418_v2  ;;  %v2443_v12 = vrot.slane %v2436_v4, %v4275_v7 }
 0x7c9   : > { %v2469_v59 = vsel %vm1809_vm4, %v2043_v5, 0  ;;  %v2044_v13 = vpack.c.bf16 %v2040_v6, %v2040_v6  ;;  %v2041_v14 = vmul.f32 %v3818_v8, %v3810_v33  ;;  %v3791_v5 = vld [vmem:[%s4139_s21] sm:$0xff]  }
 0x7ca   : > { %v3820_v15 = vpop.eup %3819  ;;  %v2426_v17 = vrot.slane %v2419_v11, %v4280_v16  ;;  %v2444_v18 = vcombine.low %v2435_v10, %v2443_v12  ;;  %3630 = vmatpush3.bf16.xpose.msra.mxu0 %v2469_v59 }
 0x7cb   : > { %v2515_v19 = vsel %vm1809_vm4, %v2044_v13, 0  ;;  %3641 = vmatprep.subr.bf16.mxu0 %v3924_v34  ;;  %v2042_v20 = vmul.f32 %v3820_v15, %v3812_v35  ;;  %v2045_v22 = vpack.c.bf16 %v2041_v14, %v2041_v14  ;;  %v3792_v15 = vld [vmem:[%s4139_s21 + $0x8] sm:$0xff]   ;;  %s3934_s21 = smov 16  }
 0x7cc   : > { %v2451_v21 = vrot.slane %v2444_v18, %v4280_v16  ;;  %3636 = vmatpush3.bf16.xpose.msra.mxu1 %v2515_v19  ;;  %v2456_v23 = vshrl.u32 %v2426_v17, 16  ;;  %v2427_v26 = vcombine.high %v2426_v17, %v3932_v9 }
 0x7cd   : > { %3647 = vmatprep.subr.bf16.mxu1 %v3924_v34  ;;  %v2046_v42 = vpack.c.bf16 %v2042_v20, %v2042_v20  ;;  %v2561_v28 = vsel %vm1809_vm4, %v2045_v22, 0 }
 0x7ce   : > { %v2455_v24 = vpack.i.b16 %v2451_v21, %v2426_v17  ;;  %v2457_v25 = vshrl.u32 %v2451_v21, 16  ;;  %v2452_v27 = vcombine.high %v2451_v21, %v3932_v9  ;;  %v2462_v63 = vshrl.u32 %v2427_v26, 16 }
 0x7cf   : > { %v2607_v29 = vsel %vm1809_vm4, %v2046_v42, 0 }
 0x7d0   : > { %v2458_v3 = vpack.i.b16 %v2457_v25, %v2456_v23  ;;  %v2463_v30 = vshrl.u32 %v2452_v27, 16  ;;  %v2461_v31 = vpack.i.b16 %v2452_v27, %v2427_v26 }
 0x7d1   : > { %3632 = vmatmul.mubr.msk.bf16.vlgmr.msra.gmra.mrb[4].mxu0 %vm1809_vm4, %v2455_v24 }
 0x7d2   : > { %3642 = vmatpush3.bf16.xpose.msra.mxu0 %v2561_v28  ;;  %3643 = vmatprep.mubr.msk.bf16.mxu0 %vm3925_vm2, %v3924_v34  ;;  %v2464_v33 = vpack.i.b16 %v2463_v30, %v2462_v63 }
 0x7d3   : > { %3638 = vmatmul.mubr.msk.bf16.vlgmr.msra.gmra.mrb[16].mxu1 %vm1809_vm4, %v2458_v3  ;;  %3653 = vmatprep.subr.bf16.mxu0 %v3924_v34 }
 0x7d4   : > { %3648 = vmatpush3.bf16.xpose.msra.mxu1 %v2607_v29  ;;  %3649 = vmatprep.mubr.msk.bf16.mxu1 %vm3925_vm2, %v3924_v34 }
 0x7d5   : > { %3661 = vmatprep.subr.bf16.mxu1 %v3924_v34 }
 0x7d9   : > { %3644 = vmatmul.mubr.msk.bf16.vlgmr.msra.gmra.mrb[8].mxu0 %vm1809_vm4, %v2461_v31 }
 0x7da   : > { %3657 = vmatprep.mubr.msk.bf16.mxu0 %vm3925_vm2, %v3924_v34  ;;  %3654 = vmatpush3.bf16.msra.mxu0 %v3791_v5 }
 0x7db   : > { %3650 = vmatmul.mubr.msk.bf16.vlgmr.msra.gmra.mrb[20].mxu1 %vm1809_vm4, %v2464_v33  ;;  %3655 = vmatprep.subr.bf16.mxu0 %v3924_v34 }
 0x7dc   : > { %3665 = vmatprep.mubr.msk.bf16.mxu1 %vm3925_vm2, %v3924_v34 }
 0x7de   : > { %3656 = vmatpush3.bf16.msra.mxu0 %v3792_v15 }
 0x7df   : > { %3669 = vmatprep.subr.bf16.mxu0 %v3924_v34 }
 0x8a4   : > { %v2505_v9 = vpop.f32.mrb[4].mxu0 }
 0x8a5   : > { %2649 = vxpose.xlu1.b32.start.end [1/1] (short) (narrow) %v2505_v9, 8  ;;  %v3633_v32 = vpop.f32.mrb[5].mxu0 }
 0x8a6   : > { %v2508_v35 = vpop.f32.mrb[6].mxu0  ;;  %v2551_v36 = vpop.f32.mrb[16].mxu1 }
 0x8a7   : > { %v3634_v37 = vpop.f32.mrb[7].mxu0  ;;  %2681 = vxpose.xlu0.b32.start.end [1/1] (short) (narrow) %v2551_v36, 8  ;;  %v3639_v38 = vpop.f32.mrb[17].mxu1  ;;  %v3510_v35 = vld [vmem:[%s4664_s17] ss:$0 sm:$0xff] }
 0x8a8   : > { %v2554_v39 = vpop.f32.mrb[18].mxu1 }
 0x8a9   : > { %v3640_v53 = vpop.f32.mrb[19].mxu1 }
 0x8aa   : > { %v3825_v53 = vld [vmem:[#allocation2] sm:$0xff] }
 0x8ac   : > { %v2597_v58 = vpop.f32.mrb[8].mxu0 }
 0x8ad   : > { %v3645_v40 = vpop.f32.mrb[9].mxu0  ;;  %2713 = vxpose.xlu0.b32.start.end [1/1] (short) (narrow) %v2597_v58, 8 }
 0x8ae   : > { %v2600_v57 = vpop.f32.mrb[10].mxu0  ;;  %v2643_v41 = vpop.f32.mrb[20].mxu1 }
 0x8af   : > { %v3646_v43 = vpop.f32.mrb[11].mxu0  ;;  %v3651_v44 = vpop.f32.mrb[21].mxu1 }
 0x8b0   : > { %v2646_v45 = vpop.f32.mrb[22].mxu1  ;;  %v3793_v44 = vld [vmem:[%s4156_s25] sm:$0xff]  }
 0x8b1   : > { %2745 = vxpose.xlu0.b32.start.end [1/1] (short) (narrow) %v2643_v41, 8  ;;  %v3652_v46 = vpop.f32.mrb[23].mxu1  ;;  %3662 = vmatpush3.bf16.msra.mxu1 %v3793_v44  ;;  %v3794_v45 = vld [vmem:[%s4156_s25 + $0x8] sm:$0xff]  }
 0x8b2   : > { %3663 = vmatprep.subr.bf16.mxu1 %v3924_v34  ;;  %v3795_v46 = vld [vmem:[%s4170_s20] sm:$0xff]  }
 0x8b5   : > { %3664 = vmatpush3.bf16.msra.mxu1 %v3794_v45 }
 0x925   : > { %v2665_v49 = vpop.trf.xlu1 }
 0x927   : > { %v2697_v47 = vpop.trf.xlu0 }
 0x92d   : > { %v2729_v48 = vpop.trf.xlu0 }
 0x92e   : > { %v2777_v50 = vcombine.low %v2665_v49, %v2729_v48  ;;  %v2778_v51 = vcombine.high %v2665_v49, %v2729_v48  ;;  %v3797_v48 = vld [vmem:[%s4170_s20 + $0x10] sm:$0xff]  }
 0x930   : > { %v2785_v56 = vrot.slane %v2777_v50, %v4275_v7  ;;  %v2792_v60 = vrot.slane %v2778_v51, %v4275_v7 }
 0x931   : > { %v2761_v52 = vpop.trf.xlu0 }
 0x932   : > { %v2793_v54 = vcombine.low %v2697_v47, %v2761_v52  ;;  %v2794_v55 = vcombine.high %v2697_v47, %v2761_v52  ;;  %v3796_v47 = vld [vmem:[%s4170_s20 + $0x8] sm:$0xff]  }
 0x934   : > { %v2801_v61 = vrot.slane %v2793_v54, %v4275_v7  ;;  %v2808_v62 = vrot.slane %v2794_v55, %v4275_v7 }
 0x936   : > { %v2809_v0 = vcombine.low %v2785_v56, %v2801_v61  ;;  %v2810_v1 = vcombine.high %v2785_v56, %v2801_v61  ;;  %v2825_v2 = vcombine.low %v2792_v60, %v2808_v62  ;;  %v2826_v4 = vcombine.high %v2792_v60, %v2808_v62  ;;  %v3514_v62 = vld [vmem:[%s4665_s0] ss:$0 sm:$0xff] }
 0x938   : > { %v2817_v6 = vrot.slane %v2809_v0, %v4280_v16  ;;  %v2824_v8 = vrot.slane %v2810_v1, %v4280_v16  ;;  %v2833_v10 = vrot.slane %v2825_v2, %v4280_v16  ;;  %v2840_v11 = vrot.slane %v2826_v4, %v4280_v16  ;;  %v3515_v1 = vld [vmem:[%s4666_s26] ss:$0 sm:$0xff] }
 0x93a   : > { %v2845_v12 = vcombine.low %v2817_v6, %v2824_v8  ;;  %v3508_v59 = vcombine.high %v2817_v6, %v2824_v8  ;;  %v2861_v13 = vcombine.low %v2833_v10, %v2840_v11  ;;  %v3509_v14 = vcombine.high %v2833_v10, %v2840_v11  ;;  %v3798_v6 = vld [vmem:[%s4170_s20 + $0x18] sm:$0xff]   ;;  %v3799_v8 = vld [vmem:[%s4170_s20 + $0x20] sm:$0xff]   ;;  %v3800_v10 = vld [vmem:[%s4170_s20 + $0x28] sm:$0xff]  }
 0x93b   : > { %v3801_v11 = vld [vmem:[%s4170_s20 + $0x30] sm:$0xff]  }
 0x93c   : > { %v2852_v17 = vrot.slane %v2845_v12, %v4275_v7  ;;  %v2860_v18 = vrot.slane %v3508_v59, %v4275_v7  ;;  %v2868_v19 = vrot.slane %v2861_v13, %v4275_v7  ;;  %v2876_v20 = vrot.slane %v3509_v14, %v4275_v7  ;;  %v3802_v12 = vld [vmem:[%s4170_s20 + $0x38] sm:$0xff]   ;;  %v3516_v59 = vld [vmem:[%s769_s23] ss:$0 sm:$0xff]  ;;  %s4667_s23 = sld [smem:[#allocation9_spill]] }
 0x93e   : > { %v2878_v21 = vcombine.high %v2852_v17, %v2860_v18  ;;  %v2894_v22 = vcombine.high %v2868_v19, %v2876_v20  ;;  %v2877_v23 = vcombine.low %v2852_v17, %v2860_v18  ;;  %v2893_v24 = vcombine.low %v2868_v19, %v2876_v20 }
 0x940   : > { %v2892_v25 = vrot.slane %v2878_v21, %v4280_v16  ;;  %v2908_v42 = vrot.slane %v2894_v22, %v4280_v16  ;;  %v2885_v3 = vrot.slane %v2877_v23, %v4280_v16  ;;  %v2901_v27 = vrot.slane %v2893_v24, %v4280_v16  ;;  %v3520_v24 = vld [vmem:[%s777_s18] ss:$0 sm:$0xff] }
 0x942   : > { %v2911_v28 = vcombine.low %v2892_v25, %v2908_v42  ;;  %v2910_v26 = vcombine.high %v2885_v3, %v2901_v27  ;;  %v2909_v29 = vcombine.low %v2885_v3, %v2901_v27  ;;  %v2912_v7 = vcombine.high %v2892_v25, %v2908_v42  ;;  %p3529_p1 = scmp.ne.s32.totalorder %s4667_s23, 1 }
 0x943   : > { %s4669_s28 = sld [smem:[#allocation27_spill]] (!%p3529_p1) }
 0x944   : > { %2918 = vrot.lane.b32.xlu0 %v2911_v28, %s3934_s21  ;;  %2914 = vrot.lane.b32.xlu1 %v2910_v26, %s3935_s2  ;;  %s4668_s21 = sld [smem:[#allocation26_spill]] (!%p3529_p1) }
 0x948   : > { %2922 = vrot.lane.b32.xlu1 %v2912_v7, %s3936_s8 }
 0x9b6   : > { %v2915_v30 = vpop.permute.xlu1 %2914  ;;  %v2919_v63 = vpop.permute.xlu0 %2918 }
 0x9b7   : > { %v2925_v31 = vsel %vm1809_vm4, %v2909_v29, %v2915_v30 }
 0x9b8   : > { %v2927_v9 = vsel %vm2926_vm5, %v2925_v31, %v2919_v63 }
 0x9ba   : > { %v2923_v33 = vpop.permute.xlu1 %2922 }
 0x9bb   : > { %v2929_v16 = vsel %vm2928_vm6, %v2927_v9, %v2923_v33 }
 0x9bc   : > { %v2930_v32 = vpack.c.bf16 %v2929_v16, %v2929_v16 }
 0x9be   : > { %3658 = vmatmul.mubr.msk.bf16.vlgmr.msra.gmra.mrb[12].mxu0 %vm969_vm1, %v2930_v32 }
 0x9bf   : > { %3685 = vmatprep.mubr.msk.bf16.mxu0 %vm3925_vm2, %v3924_v34  ;;  %3670 = vmatpush3.bf16.msra.mxu0 %v3795_v46 }
 0x9c0   : > { %3671 = vmatprep.subr.bf16.mxu0 %v3924_v34 }
 0x9c3   : > { %3672 = vmatpush3.bf16.msra.mxu0 %v3796_v47 }
 0x9c4   : > { %3673 = vmatprep.subr.bf16.mxu0 %v3924_v34 }
 0x9c7   : > { %3674 = vmatpush3.bf16.msra.mxu0 %v3797_v48 }
 0x9c8   : > { %3675 = vmatprep.subr.bf16.mxu0 %v3924_v34 }
 0x9cb   : > { %3676 = vmatpush3.bf16.msra.mxu0 %v3798_v6 }
 0x9cc   : > { %3677 = vmatprep.subr.bf16.mxu0 %v3924_v34 }
 0x9cf   : > { %3678 = vmatpush3.bf16.msra.mxu0 %v3799_v8 }
 0x9d0   : > { %3679 = vmatprep.subr.bf16.mxu0 %v3924_v34 }
 0x9d3   : > { %3680 = vmatpush3.bf16.msra.mxu0 %v3800_v10 }
 0x9d4   : > { %3681 = vmatprep.subr.bf16.mxu0 %v3924_v34 }
 0x9d7   : > { %3682 = vmatpush3.bf16.msra.mxu0 %v3801_v11 }
 0x9d8   : > { %3683 = vmatprep.subr.bf16.mxu0 %v3924_v34 }
 0x9db   : > { %3684 = vmatpush3.bf16.msra.mxu0 %v3802_v12 }
 0xa91   : > { %v2991_v36 = vpop.f32.mrb[12].mxu0 }
 0xa92   : > { %v2992_v37 = vadd.f32 %v3510_v35, %v2991_v36  ;;  %v3659_v38 = vpop.f32.mrb[13].mxu0 }
 0xa93   : > { %v2994_v39 = vpop.f32.mrb[14].mxu0 }
 0xa94   : > { %v4475_v58 = vadd.f32 %v3825_v53, %v2992_v37  ;;  %v3660_v40 = vpop.f32.mrb[15].mxu0  ;;  %v3530_v39 = vld [vmem:[%s4668_s21] ss:$0 sm:$0xff] (!%p3529_p1) }
 0xa96   : > { %v3000_v57 = vsel %vm969_vm1, %v4475_v58, 0.0  ;;  %v3004_v41 = vmul.f32 %v4475_v58, %v4475_v58 }
 0xa97   : > { %3001 = vadd.xlane.f32.xlu1 %v3000_v57 }
 0xa98   : > { %v3005_v43 = vsel %vm969_vm1, %v3004_v41, 0.0 }
 0xa99   : > { %3006 = vadd.xlane.f32.xlu0 %v3005_v43 }
 0xb24   : > { %v3002_v49 = vpop.xlane.xlu1 %3001 }
 0xb25   : > { %v3003_v50 = vmul.f32 0.03125, %v3002_v49 }
 0xb26   : > { %v3007_v51 = vpop.xlane.xlu0 %3006 }
 0xb27   : > { %v3009_v52 = vmul.f32 %v3003_v50, %v3003_v50  ;;  %v3008_v54 = vmul.f32 0.03125, %v3007_v51  ;;  %v3011_v60 = vsub.f32 %v4475_v58, %v3003_v50 }
 0xb29   : > { %v3010_v55 = vsub.f32 %v3008_v54, %v3009_v52 }
 0xb2b   : > { %v3012_v56 = vadd.f32 1e-05, %v3010_v55 }
 0xb2d   : > { %3821 = vrsqrt.f32 %v3012_v56 }
 0xb37   : > { %v3822_v61 = vpop.eup %3821 }
 0xb38   : > { %v3014_v0 = vmul.f32 %v3822_v61, %v3011_v60 }
 0xb3a   : > { %v3021_v2 = vmul.f32 %v3514_v62, %v3014_v0 }
 0xb3c   : > { %v3028_v4 = vadd.f32 %v3515_v1, %v3021_v2 }
 0xb3e   : > { %v3029_v5 = vpack.c.bf16 %v3028_v4, %v3028_v4 }
 0xb40   : > { %3666 = vmatmul.mubr.msk.bf16.vlgmr.msra.gmra.mrb[24].mxu1 %vm969_vm1, %v3029_v5 }
 0xc13   : > { %v3090_v13 = vpop.f32.mrb[24].mxu1 }
 0xc14   : > { %v3091_v14 = vadd.f32 %v3516_v59, %v3090_v13  ;;  %v3667_v15 = vpop.f32.mrb[25].mxu1 }
 0xc15   : > { %v3093_v17 = vpop.f32.mrb[26].mxu1 }
 0xc16   : > { %v3097_v18 = vmul.f32 0.70710677, %v3091_v14  ;;  %v3668_v19 = vpop.f32.mrb[27].mxu1  ;;  %v3096_v21 = vmul.f32 0.5, %v3091_v14 }
 0xc18   : > { %3823 = verf.f32 %v3097_v18 }
 0xc22   : > { %v3824_v20 = vpop.eup %3823 }
 0xc23   : > { %v3099_v22 = vadd.f32 1.0, %v3824_v20 }
 0xc25   : > { %v3100_v23 = vmul.f32 %v3099_v22, %v3096_v21 }
 0xc27   : > { %v3101_v34 = vpack.c.bf16 %v3100_v23, %v3100_v23 }
 0xc29   : > { %3686 = vmatmul.mubr.bf16.vlgmr.msra.gmra.mrb[16].mxu0 %v3101_v34 }
 0xcfb   : > { %3218 = sbr.rel (%p3529_p1) target bundleno = 3508 (0xdb4), region = 100 }
 0xcfc   : > { %v3207_v25 = vpop.f32.mrb[16].mxu0 }
 0xcfd   : > { %v3208_v42 = vadd.f32 %v3520_v24, %v3207_v25  ;;  %v3687_v3 = vpop.f32.mrb[17].mxu0 }
 0xcfe   : > { %v3210_v27 = vpop.f32.mrb[18].mxu0 }
 0xcff   : > { %v3213_v28 = vadd.f32 %v3208_v42, %v4475_v58  ;;  %v3688_v26 = vpop.f32.mrb[19].mxu0  ;;  %v3531_v58 = vld [vmem:[%s4669_s28] ss:$0 sm:$0xff] (!%p3529_p1) }
 0xd01   : > { %3214 = vst.msk [vmem:[#allocation2] sm:$0xff] %vm969_vm1, %v3213_v28 }
 0xd08   : > { %v3219_v29 = vld [vmem:[#allocation2] sm:$0xff] }
 0xd09   : > { %v3222_v7 = vsel %vm969_vm1, %v3219_v29, 0.0  ;;  %v3226_v30 = vmul.f32 %v3219_v29, %v3219_v29 }
 0xd0a   : > { %3223 = vadd.xlane.f32.xlu0 %v3222_v7 }
 0xd0b   : > { %v3227_v63 = vsel %vm969_vm1, %v3226_v30, 0.0 }
 0xd0e   : > { %3228 = vadd.xlane.f32.xlu0 %v3227_v63 }
 0xd97   : > { %v3224_v31 = vpop.xlane.xlu0 %3223 }
 0xd98   : > { %v3225_v33 = vmul.f32 0.03125, %v3224_v31 }
 0xd9a   : > { %v3231_v16 = vmul.f32 %v3225_v33, %v3225_v33  ;;  %v3233_v37 = vsub.f32 %v3219_v29, %v3225_v33 }
 0xd9b   : > { %v3229_v9 = vpop.xlane.xlu0 %3228 }
 0xd9c   : > { %v3230_v32 = vmul.f32 0.03125, %v3229_v9 }
 0xd9e   : > { %v3232_v35 = vsub.f32 %v3230_v32, %v3231_v16 }
 0xda0   : > { %v3234_v36 = vadd.f32 1e-05, %v3232_v35 }
 0xda2   : > { %3826 = vrsqrt.f32 %v3234_v36 }
 0xdac   : > { %v3827_v38 = vpop.eup %3826 }
 0xdad   : > { %v3236_v53 = vmul.f32 %v3827_v38, %v3233_v37 }
 0xdaf   : > { %v3243_v40 = vmul.f32 %v3530_v39, %v3236_v53 }
 0xdb1   : > { %v3250_v57 = vadd.f32 %v3531_v58, %v3243_v40 }
 0xdb3   : > { %3251 = vst.msk [vmem:[%s728_s16] sm:$0xff] %vm969_vm1, %v3250_v57 }
 0xdb4 PF: > { %s4670_s24 = sld [smem:[#allocation10_spill]]  ;;  %s4671_s17 = sld [smem:[#allocation7_spill]] }
 0xdb5   : > { %s4673_s1 = sld [smem:[#allocation28_spill]]  ;;  %s3266_s3 = sshll.u32 %s728_s16, 4  ;;  %s3267_s3 = int_to_ptr.vmem [resolvable:$true] %s3266_s3 }
 0xdb6   : > { %s3828_s23 = scalar_lea.vmem %s3267_s3, 128  ;;  %s3937_s27 = smov [#allocation3]  }
 0xdb7   : > { %p3829_p2 = scmp.ne.s32.totalorder %s3267_s3, %s3828_s23  ;;  %s3832_s18 = sshll.u32 %s3937_s27, 4  ;;  %s3833_s18 = int_to_ptr.vmem [resolvable:$false] %s3832_s18 }
 0xdb8   : > { %s3834_s21 = scalar_lea.vmem %s3833_s18, 256  ;;  %p3835_p6 = scmp.lt.s32.totalorder %s3267_s3, %s3833_s18 }
 0xdb9   : > { %p3830_p4 = pnand %p3829_p2, %p4082_p3  ;;  %p3836_p7 = scmp.lt.s32.totalorder %s3834_s21, %s3828_s23 }
 0xdba   : > { %s3533_s5 = sshll.u32 %s4670_s24, 7  ;;  %s4675_s20 = sand.u32 1, %s4671_s17  }
 0xdbb   : > { %s4674_s26 = smov %s4673_s1  ;;  %s4540_s29 = scalar_lea.hbm %s4673_s1, %s3533_s5 }
 0xdbc   : > { %s3253_s22 = scalar_lea.sflag [#allocation4], %s4675_s20  ;;  %p3831_p5 = pneg %p3830_p4 }
 0xdbd   : > { %p3837_p8 = por %p3836_p7, %p3835_p6 }
 0xdbf   : > { %p3838_p10 = pnand %p3837_p8, %p3831_p5 }
 0xdc1   : > { %3841 = shalt.err (!%p3838_p10)
}
 0xdc2   : > { %s3842_s19 = scalar_lea.hbm %s4540_s29, 128  ;;  %s3846_s8 = scalar_lea.hbm %s4674_s26, 256 }
 0xdc3   : > { %p3843_p11 = scmp.ne.s32.totalorder %s4540_s29, %s3842_s19  ;;  %p3847_p0 = scmp.lt.u32.totalorder %s4540_s29, %s4674_s26 }
 0xdc4   : > { %p3848_p1 = scmp.lt.u32.totalorder %s3846_s8, %s3842_s19  ;;  %p3850_p4 = scmp.lt.u32.totalorder %s3842_s19, %s4540_s29 }
 0xdc5   : > { %p3844_p12 = pnand %p3843_p11, %p4082_p3 }
 0xdc6   : > { %p3849_p2 = por %p3848_p1, %p3847_p0 }
 0xdc7   : > { %p3845_p13 = pneg %p3844_p12 }
 0xdc8   : > { %p3851_p5 = por %p3850_p4, %p3849_p2 }
 0xdca   : > { %p3852_p6 = pnand %p3851_p5, %p3845_p13 }
 0xdcc   : > { %3855 = shalt.err (!%p3852_p6)
}
 0xdcd   : > { %3689 = dma.vmem_to_hbm [thread:$0]  (%p4082_p3), %s3267_s3, 128, %s4540_s29, %s3253_s22  }
 0xdce PF: > { %s4676_s17 = sld [smem:[#allocation13_spill]]  ;;  %s4677_s5 = sld [smem:[#allocation6_spill]] }
 0xdd4   : > { %p3695_p7 = scmp.ge.s32.totalorder %s4676_s17, 2  ;;  %s3278_s30 = sand.u32 1, %s4677_s5  }
 0xdd5   : > { %s3279_s1 = scalar_lea.sflag [#allocation4], %s3278_s30 }
 0xdd6   : > { %p3692_p8 = pnand %p3695_p7, %p4092_p9 }
 0xdd8   : > { %3889 = dma.done.wait (!%p3692_p8), %s3279_s1, 128  }
 0xdd9   : > { %3891 = vsyncadd (!%p3692_p8), %s3279_s1, 4294967168  ;;  %s31_s20 = sadd.s32 1, %s4676_s17   ;;  %s4679_s27 = sld [smem:[#allocation7_spill]] }
 0xdda   : > { %p28_p10 = scmp.ge.s32.totalorder %s31_s20, 6   ;;  %s4680_s28 = sld [smem:[#allocation8_spill]] }
 0xddb   : > { %s4681_s29 = sld [smem:[#allocation18_spill]]  ;;  %s4682_s30 = sld [smem:[#allocation11_spill]] }
 0xddc   : > { %s4683_s0 = sld [smem:[#allocation12_spill]]  ;;  %s4684_s19 = sld [smem:[#allocation14_spill]] }
 0xddd   : > { %s4685_s1 = sld [smem:[#allocation16_spill]]  ;;  %30 = sbr.rel (!%p28_p10) target bundleno = 16 (0x10), region = 171 }
 0xde4   :  { %3284 = vsyncpa [#allocation4], 1 }
 0xde5   :  { %3286 = vsyncpa [#allocation4 + $0x1], 1 }

</bundles_post_ra>
